<compile_context>
chip_gen: v5e
topology: v5e:2x2
jax: 0.10.0
libtpu: 0.0.40
codegen_flags: <defaults>
</compile_context>

<pallas_src>
import functools

import jax
import jax.numpy as jnp
from jax import lax
from jax.experimental import pallas as pl
from jax.experimental.pallas import tpu as pltpu

# 3x3 tap offsets (dy, dx), dy outer / dx inner — must match weight packing.
_TAPS = tuple((dy, dx) for dy in (-1, 0, 1) for dx in (-1, 0, 1))


def _ae_fused_kernel(x_ref, mask_ref, w1_ref, b1_ref, w2_ref, b2_ref,
                     w3_ref, b3_ref, w4_ref, b4_ref, o_ref, *, H, W):
    """Fused encoder+decoder forward for one image.

    x_ref   : (1, Cin0, H*W)   input image, channels on sublanes (VMEM)
    mask_ref: (9, H*W)         1.0/0.0 border-validity mask per tap (VMEM)
    wK_ref  : (CoutK, 9*CinK)  im2col-packed weights (VMEM)
    bK_ref  : (CoutK, 1)       bias (VMEM)
    o_ref   : (1, Cout4, H*W)  output, lane-dense last dim (VMEM)
    """
    masks = mask_ref[...]  # (9, HW) — shared by all four layers

    def conv3x3(x, w_ref, b_ref, act):
        """x: (Cin, HW) -> (Cout, HW). One im2col matmul on the MXU."""
        taps = []
        for t, (dy, dx) in enumerate(_TAPS):
            shift = dy * W + dx
            # shifted[:, p] == x[:, p + shift]  (wrap-around zeroed by mask)
            shifted = x if shift == 0 else jnp.roll(x, -shift, axis=1)
            taps.append(shifted * masks[t:t + 1, :])
        patches = jnp.concatenate(taps, axis=0)          # (9*Cin, HW)
        y = jnp.dot(w_ref[...], patches,
                    preferred_element_type=jnp.float32)  # (Cout, HW)
        y = y + b_ref[...]                               # lane-broadcast bias
        if act == "relu":
            return jnp.maximum(y, 0.0)
        return jax.nn.sigmoid(y)

    a = x_ref[0].astype(jnp.float32)            # (Cin0, HW)
    a = conv3x3(a, w1_ref, b1_ref, "relu")      # encoder
    a = conv3x3(a, w2_ref, b2_ref, "relu")
    a = conv3x3(a, w3_ref, b3_ref, "relu")      # decoder
    a = conv3x3(a, w4_ref, b4_ref, "sigmoid")
    o_ref[0] = a.astype(o_ref.dtype)


def _prep_conv(w_oihw, b):
    """OIHW weights -> (Cout, 9*Cin) im2col matrix; bias -> (Cout, 1)."""
    cout, cin = w_oihw.shape[0], w_oihw.shape[1]
    wmat = jnp.transpose(w_oihw, (0, 2, 3, 1)).reshape(cout, 9 * cin)
    return wmat, b.reshape(cout, 1)


def _tap_masks(H, W, dtype):
    """(9, H*W) 1.0/0.0 masks: tap (dy,dx) valid iff (h+dy, w+dx) in-bounds."""
    ii = jnp.arange(H)
    jj = jnp.arange(W)
    rows = []
    for dy, dx in _TAPS:
        mh = (ii + dy >= 0) & (ii + dy < H)
        mw = (jj + dx >= 0) & (jj + dx < W)
        rows.append((mh[:, None] & mw[None, :]).reshape(H * W))
    return jnp.stack(rows).astype(dtype)


def autoencoder_forward(x_nchw, params):
    """Autoencoder.forward: decoder(encoder(x)); NCHW in / NCHW out."""
    N, C0, H, W = x_nchw.shape
    HW = H * W
    x_flat = x_nchw.reshape(N, C0, HW)            # NCHW -> (N, C, HW), no copy
    masks = _tap_masks(H, W, x_nchw.dtype)

    w1, b1 = _prep_conv(*params["enc1"])
    w2, b2 = _prep_conv(*params["enc2"])
    w3, b3 = _prep_conv(*params["dec1"])
    w4, b4 = _prep_conv(*params["dec2"])
    c_out = w4.shape[0]

    def const_spec(a):
        return pl.BlockSpec(a.shape, lambda n: (0,) * a.ndim)

    kernel = functools.partial(_ae_fused_kernel, H=H, W=W)
    out_flat = pl.pallas_call(
        kernel,
        out_shape=jax.ShapeDtypeStruct((N, c_out, HW), x_nchw.dtype),
        grid_spec=pltpu.PrefetchScalarGridSpec(
            num_scalar_prefetch=0,
            grid=(N,),
            in_specs=[
                pl.BlockSpec((1, C0, HW), lambda n: (n, 0, 0)),
                const_spec(masks),
                const_spec(w1), const_spec(b1),
                const_spec(w2), const_spec(b2),
                const_spec(w3), const_spec(b3),
                const_spec(w4), const_spec(b4),
            ],
            out_specs=pl.BlockSpec((1, c_out, HW), lambda n: (n, 0, 0)),
        ),
        compiler_params=pltpu.CompilerParams(
            dimension_semantics=("parallel",)),
    )(x_flat, masks, w1, b1, w2, b2, w3, b3, w4, b4)
    return out_flat.reshape(N, c_out, H, W)


def init_conv_params(key, cin, cout):
    """Deterministic Conv2d-like init: OIHW weights + bias."""
    kw, kb = jax.random.split(key)
    fan_in = cin * 9
    bound = 1.0 / jnp.sqrt(fan_in)
    w = jax.random.uniform(kw, (cout, cin, 3, 3), jnp.float32, -bound, bound)
    b = jax.random.uniform(kb, (cout,), jnp.float32, -bound, bound)
    return w, b


def autoencoder_reference(x_nchw, params):
    """Pure-JAX reference (lax.conv in NCHW/OIHW) for correctness checking."""
    def conv(x, w, b, act):
        dn = lax.conv_dimension_numbers(x.shape, w.shape,
                                        ("NCHW", "OIHW", "NCHW"))
        y = lax.conv_general_dilated(x, w, (1, 1), "SAME",
                                     dimension_numbers=dn)
        y = y + b[None, :, None, None]
        if act == "relu":
            return jnp.maximum(y, 0.0)
        return jax.nn.sigmoid(y)

    x = conv(x_nchw, *params["enc1"], "relu")
    x = conv(x, *params["enc2"], "relu")
    x = conv(x, *params["dec1"], "relu")
    x = conv(x, *params["dec2"], "sigmoid")
    return x


if __name__ == "__main__":
    key = jax.random.PRNGKey(0)
    kx, k1, k2, k3, k4 = jax.random.split(key, 5)

    # NCHW input consistent with the conv autoencoder: (N=2, C=4, H=16, W=16)
    x = jax.random.normal(kx, (2, 4, 16, 16), jnp.float32)

    params = {
        "enc1": init_conv_params(k1, 4, 8),
        "enc2": init_conv_params(k2, 8, 16),
        "dec1": init_conv_params(k3, 16, 8),
        "dec2": init_conv_params(k4, 8, 4),
    }

    out = jax.jit(autoencoder_forward)(x, params)
    out = jax.block_until_ready(out)

    ref = autoencoder_reference(x, params)
    assert out.shape == (2, 4, 16, 16)
    assert jnp.allclose(out, ref, atol=1e-5, rtol=1e-5), "mismatch vs reference"

    print("KERNEL_OK")
</pallas_src>

<mosaic_0001>
module attributes {stable_mosaic.version = 11 : i64} {
  func.func @_ae_fused_kernel(%arg0: i32, %arg1: memref<1x4x256xf32, #tpu.memory_space<vmem>>, %arg2: memref<9x256xf32, #tpu.memory_space<vmem>>, %arg3: memref<8x36xf32, #tpu.memory_space<vmem>>, %arg4: memref<8x1xf32, #tpu.memory_space<vmem>>, %arg5: memref<16x72xf32, #tpu.memory_space<vmem>>, %arg6: memref<16x1xf32, #tpu.memory_space<vmem>>, %arg7: memref<8x144xf32, #tpu.memory_space<vmem>>, %arg8: memref<8x1xf32, #tpu.memory_space<vmem>>, %arg9: memref<4x72xf32, #tpu.memory_space<vmem>>, %arg10: memref<4x1xf32, #tpu.memory_space<vmem>>, %arg11: memref<1x4x256xf32, #tpu.memory_space<vmem>>) attributes {dimension_semantics = [#tpu.dimension_semantics<parallel>], iteration_bounds = array<i64: 2>, scalar_prefetch = 0 : i64, scratch_operands = 0 : i64, tpu.core_type = #tpu.core_type<tc>, window_params = [{transform_indices = @transform_0, window_bounds = array<i64: 1, 4, 256>}, {pipeline_mode = #tpu.pipeline_mode<synchronous>, transform_indices = @transform_1, window_bounds = array<i64: 9, 256>}, {pipeline_mode = #tpu.pipeline_mode<synchronous>, transform_indices = @transform_2, window_bounds = array<i64: 8, 36>}, {pipeline_mode = #tpu.pipeline_mode<synchronous>, transform_indices = @transform_3, window_bounds = array<i64: 8, 1>}, {pipeline_mode = #tpu.pipeline_mode<synchronous>, transform_indices = @transform_4, window_bounds = array<i64: 16, 72>}, {pipeline_mode = #tpu.pipeline_mode<synchronous>, transform_indices = @transform_5, window_bounds = array<i64: 16, 1>}, {pipeline_mode = #tpu.pipeline_mode<synchronous>, transform_indices = @transform_6, window_bounds = array<i64: 8, 144>}, {pipeline_mode = #tpu.pipeline_mode<synchronous>, transform_indices = @transform_7, window_bounds = array<i64: 8, 1>}, {pipeline_mode = #tpu.pipeline_mode<synchronous>, transform_indices = @transform_8, window_bounds = array<i64: 4, 72>}, {pipeline_mode = #tpu.pipeline_mode<synchronous>, transform_indices = @transform_9, window_bounds = array<i64: 4, 1>}, {transform_indices = @transform_10, window_bounds = array<i64: 1, 4, 256>}]} {
    %c0 = arith.constant 0 : index
    %c0_0 = arith.constant 0 : index
    %0 = vector.load %arg2[%c0, %c0_0] : memref<9x256xf32, #tpu.memory_space<vmem>>, vector<9x256xf32>
    %c0_1 = arith.constant 0 : index
    %c0_2 = arith.constant 0 : index
    %c0_3 = arith.constant 0 : index
    %1 = vector.load %arg1[%c0_1, %c0_2, %c0_3] : memref<1x4x256xf32, #tpu.memory_space<vmem>>, vector<1x4x256xf32>
    %2 = vector.shape_cast %1 : vector<1x4x256xf32> to vector<4x256xf32>
    %3 = vector.extract_strided_slice %2 {offsets = [0, 239], sizes = [4, 17], strides = [1, 1]} : vector<4x256xf32> to vector<4x17xf32>
    %4 = vector.extract_strided_slice %2 {offsets = [0, 0], sizes = [4, 239], strides = [1, 1]} : vector<4x256xf32> to vector<4x239xf32>
    %5 = tpu.concatenate %3, %4 in 1 : vector<4x17xf32>, vector<4x239xf32> -> vector<4x256xf32>
    %6 = vector.extract_strided_slice %0 {offsets = [0, 0], sizes = [1, 256], strides = [1, 1]} : vector<9x256xf32> to vector<1x256xf32>
    %7 = vector.broadcast %6 : vector<1x256xf32> to vector<4x256xf32>
    %8 = arith.mulf %5, %7 : vector<4x256xf32>
    %9 = vector.extract_strided_slice %2 {offsets = [0, 240], sizes = [4, 16], strides = [1, 1]} : vector<4x256xf32> to vector<4x16xf32>
    %10 = vector.extract_strided_slice %2 {offsets = [0, 0], sizes = [4, 240], strides = [1, 1]} : vector<4x256xf32> to vector<4x240xf32>
    %11 = tpu.concatenate %9, %10 in 1 : vector<4x16xf32>, vector<4x240xf32> -> vector<4x256xf32>
    %12 = vector.extract_strided_slice %0 {offsets = [1, 0], sizes = [1, 256], strides = [1, 1]} : vector<9x256xf32> to vector<1x256xf32>
    %13 = vector.broadcast %12 : vector<1x256xf32> to vector<4x256xf32>
    %14 = arith.mulf %11, %13 : vector<4x256xf32>
    %15 = vector.extract_strided_slice %2 {offsets = [0, 241], sizes = [4, 15], strides = [1, 1]} : vector<4x256xf32> to vector<4x15xf32>
    %16 = vector.extract_strided_slice %2 {offsets = [0, 0], sizes = [4, 241], strides = [1, 1]} : vector<4x256xf32> to vector<4x241xf32>
    %17 = tpu.concatenate %15, %16 in 1 : vector<4x15xf32>, vector<4x241xf32> -> vector<4x256xf32>
    %18 = vector.extract_strided_slice %0 {offsets = [2, 0], sizes = [1, 256], strides = [1, 1]} : vector<9x256xf32> to vector<1x256xf32>
    %19 = vector.broadcast %18 : vector<1x256xf32> to vector<4x256xf32>
    %20 = arith.mulf %17, %19 : vector<4x256xf32>
    %21 = vector.extract_strided_slice %2 {offsets = [0, 255], sizes = [4, 1], strides = [1, 1]} : vector<4x256xf32> to vector<4x1xf32>
    %22 = vector.extract_strided_slice %2 {offsets = [0, 0], sizes = [4, 255], strides = [1, 1]} : vector<4x256xf32> to vector<4x255xf32>
    %23 = tpu.concatenate %21, %22 in 1 : vector<4x1xf32>, vector<4x255xf32> -> vector<4x256xf32>
    %24 = vector.extract_strided_slice %0 {offsets = [3, 0], sizes = [1, 256], strides = [1, 1]} : vector<9x256xf32> to vector<1x256xf32>
    %25 = vector.broadcast %24 : vector<1x256xf32> to vector<4x256xf32>
    %26 = arith.mulf %23, %25 : vector<4x256xf32>
    %27 = vector.extract_strided_slice %0 {offsets = [4, 0], sizes = [1, 256], strides = [1, 1]} : vector<9x256xf32> to vector<1x256xf32>
    %28 = vector.broadcast %27 : vector<1x256xf32> to vector<4x256xf32>
    %29 = arith.mulf %2, %28 : vector<4x256xf32>
    %30 = vector.extract_strided_slice %2 {offsets = [0, 1], sizes = [4, 255], strides = [1, 1]} : vector<4x256xf32> to vector<4x255xf32>
    %31 = vector.extract_strided_slice %2 {offsets = [0, 0], sizes = [4, 1], strides = [1, 1]} : vector<4x256xf32> to vector<4x1xf32>
    %32 = tpu.concatenate %30, %31 in 1 : vector<4x255xf32>, vector<4x1xf32> -> vector<4x256xf32>
    %33 = vector.extract_strided_slice %0 {offsets = [5, 0], sizes = [1, 256], strides = [1, 1]} : vector<9x256xf32> to vector<1x256xf32>
    %34 = vector.broadcast %33 : vector<1x256xf32> to vector<4x256xf32>
    %35 = arith.mulf %32, %34 : vector<4x256xf32>
    %36 = vector.extract_strided_slice %2 {offsets = [0, 15], sizes = [4, 241], strides = [1, 1]} : vector<4x256xf32> to vector<4x241xf32>
    %37 = vector.extract_strided_slice %2 {offsets = [0, 0], sizes = [4, 15], strides = [1, 1]} : vector<4x256xf32> to vector<4x15xf32>
    %38 = tpu.concatenate %36, %37 in 1 : vector<4x241xf32>, vector<4x15xf32> -> vector<4x256xf32>
    %39 = vector.extract_strided_slice %0 {offsets = [6, 0], sizes = [1, 256], strides = [1, 1]} : vector<9x256xf32> to vector<1x256xf32>
    %40 = vector.broadcast %39 : vector<1x256xf32> to vector<4x256xf32>
    %41 = arith.mulf %38, %40 : vector<4x256xf32>
    %42 = vector.extract_strided_slice %2 {offsets = [0, 16], sizes = [4, 240], strides = [1, 1]} : vector<4x256xf32> to vector<4x240xf32>
    %43 = vector.extract_strided_slice %2 {offsets = [0, 0], sizes = [4, 16], strides = [1, 1]} : vector<4x256xf32> to vector<4x16xf32>
    %44 = tpu.concatenate %42, %43 in 1 : vector<4x240xf32>, vector<4x16xf32> -> vector<4x256xf32>
    %45 = vector.extract_strided_slice %0 {offsets = [7, 0], sizes = [1, 256], strides = [1, 1]} : vector<9x256xf32> to vector<1x256xf32>
    %46 = vector.broadcast %45 : vector<1x256xf32> to vector<4x256xf32>
    %47 = arith.mulf %44, %46 : vector<4x256xf32>
    %48 = vector.extract_strided_slice %2 {offsets = [0, 17], sizes = [4, 239], strides = [1, 1]} : vector<4x256xf32> to vector<4x239xf32>
    %49 = vector.extract_strided_slice %2 {offsets = [0, 0], sizes = [4, 17], strides = [1, 1]} : vector<4x256xf32> to vector<4x17xf32>
    %50 = tpu.concatenate %48, %49 in 1 : vector<4x239xf32>, vector<4x17xf32> -> vector<4x256xf32>
    %51 = vector.extract_strided_slice %0 {offsets = [8, 0], sizes = [1, 256], strides = [1, 1]} : vector<9x256xf32> to vector<1x256xf32>
    %52 = vector.broadcast %51 : vector<1x256xf32> to vector<4x256xf32>
    %53 = arith.mulf %50, %52 : vector<4x256xf32>
    %54 = tpu.concatenate %8, %14, %20, %26, %29, %35, %41, %47, %53 in 0 : vector<4x256xf32>, vector<4x256xf32>, vector<4x256xf32>, vector<4x256xf32>, vector<4x256xf32>, vector<4x256xf32>, vector<4x256xf32>, vector<4x256xf32>, vector<4x256xf32> -> vector<36x256xf32>
    %c0_4 = arith.constant 0 : index
    %c0_5 = arith.constant 0 : index
    %55 = vector.load %arg3[%c0_4, %c0_5] : memref<8x36xf32, #tpu.memory_space<vmem>>, vector<8x36xf32>
    %cst = arith.constant dense<0.000000e+00> : vector<8x256xf32>
    %56 = tpu.matmul %55, %54, %cst {dimension_numbers = #tpu.dot_dimension_numbers<[1], [0], [0], [1], [0, 0, 1, 1], [], []>} : vector<8x36xf32>, vector<36x256xf32>, vector<8x256xf32> -> vector<8x256xf32>
    %c0_6 = arith.constant 0 : index
    %c0_7 = arith.constant 0 : index
    %57 = vector.load %arg4[%c0_6, %c0_7] : memref<8x1xf32, #tpu.memory_space<vmem>>, vector<8x1xf32>
    %58 = vector.broadcast %57 : vector<8x1xf32> to vector<8x256xf32>
    %59 = arith.addf %56, %58 : vector<8x256xf32>
    %cst_8 = arith.constant 0.000000e+00 : f32
    %60 = vector.broadcast %cst_8 : f32 to vector<8x256xf32>
    %61 = arith.maximumf %59, %60 : vector<8x256xf32>
    %62 = vector.extract_strided_slice %61 {offsets = [0, 239], sizes = [8, 17], strides = [1, 1]} : vector<8x256xf32> to vector<8x17xf32>
    %63 = vector.extract_strided_slice %61 {offsets = [0, 0], sizes = [8, 239], strides = [1, 1]} : vector<8x256xf32> to vector<8x239xf32>
    %64 = tpu.concatenate %62, %63 in 1 : vector<8x17xf32>, vector<8x239xf32> -> vector<8x256xf32>
    %65 = vector.extract_strided_slice %0 {offsets = [0, 0], sizes = [1, 256], strides = [1, 1]} : vector<9x256xf32> to vector<1x256xf32>
    %66 = vector.broadcast %65 : vector<1x256xf32> to vector<8x256xf32>
    %67 = arith.mulf %64, %66 : vector<8x256xf32>
    %68 = vector.extract_strided_slice %61 {offsets = [0, 240], sizes = [8, 16], strides = [1, 1]} : vector<8x256xf32> to vector<8x16xf32>
    %69 = vector.extract_strided_slice %61 {offsets = [0, 0], sizes = [8, 240], strides = [1, 1]} : vector<8x256xf32> to vector<8x240xf32>
    %70 = tpu.concatenate %68, %69 in 1 : vector<8x16xf32>, vector<8x240xf32> -> vector<8x256xf32>
    %71 = vector.extract_strided_slice %0 {offsets = [1, 0], sizes = [1, 256], strides = [1, 1]} : vector<9x256xf32> to vector<1x256xf32>
    %72 = vector.broadcast %71 : vector<1x256xf32> to vector<8x256xf32>
    %73 = arith.mulf %70, %72 : vector<8x256xf32>
    %74 = vector.extract_strided_slice %61 {offsets = [0, 241], sizes = [8, 15], strides = [1, 1]} : vector<8x256xf32> to vector<8x15xf32>
    %75 = vector.extract_strided_slice %61 {offsets = [0, 0], sizes = [8, 241], strides = [1, 1]} : vector<8x256xf32> to vector<8x241xf32>
    %76 = tpu.concatenate %74, %75 in 1 : vector<8x15xf32>, vector<8x241xf32> -> vector<8x256xf32>
    %77 = vector.extract_strided_slice %0 {offsets = [2, 0], sizes = [1, 256], strides = [1, 1]} : vector<9x256xf32> to vector<1x256xf32>
    %78 = vector.broadcast %77 : vector<1x256xf32> to vector<8x256xf32>
    %79 = arith.mulf %76, %78 : vector<8x256xf32>
    %80 = vector.extract_strided_slice %61 {offsets = [0, 255], sizes = [8, 1], strides = [1, 1]} : vector<8x256xf32> to vector<8x1xf32>
    %81 = vector.extract_strided_slice %61 {offsets = [0, 0], sizes = [8, 255], strides = [1, 1]} : vector<8x256xf32> to vector<8x255xf32>
    %82 = tpu.concatenate %80, %81 in 1 : vector<8x1xf32>, vector<8x255xf32> -> vector<8x256xf32>
    %83 = vector.extract_strided_slice %0 {offsets = [3, 0], sizes = [1, 256], strides = [1, 1]} : vector<9x256xf32> to vector<1x256xf32>
    %84 = vector.broadcast %83 : vector<1x256xf32> to vector<8x256xf32>
    %85 = arith.mulf %82, %84 : vector<8x256xf32>
    %86 = vector.extract_strided_slice %0 {offsets = [4, 0], sizes = [1, 256], strides = [1, 1]} : vector<9x256xf32> to vector<1x256xf32>
    %87 = vector.broadcast %86 : vector<1x256xf32> to vector<8x256xf32>
    %88 = arith.mulf %61, %87 : vector<8x256xf32>
    %89 = vector.extract_strided_slice %61 {offsets = [0, 1], sizes = [8, 255], strides = [1, 1]} : vector<8x256xf32> to vector<8x255xf32>
    %90 = vector.extract_strided_slice %61 {offsets = [0, 0], sizes = [8, 1], strides = [1, 1]} : vector<8x256xf32> to vector<8x1xf32>
    %91 = tpu.concatenate %89, %90 in 1 : vector<8x255xf32>, vector<8x1xf32> -> vector<8x256xf32>
    %92 = vector.extract_strided_slice %0 {offsets = [5, 0], sizes = [1, 256], strides = [1, 1]} : vector<9x256xf32> to vector<1x256xf32>
    %93 = vector.broadcast %92 : vector<1x256xf32> to vector<8x256xf32>
    %94 = arith.mulf %91, %93 : vector<8x256xf32>
    %95 = vector.extract_strided_slice %61 {offsets = [0, 15], sizes = [8, 241], strides = [1, 1]} : vector<8x256xf32> to vector<8x241xf32>
    %96 = vector.extract_strided_slice %61 {offsets = [0, 0], sizes = [8, 15], strides = [1, 1]} : vector<8x256xf32> to vector<8x15xf32>
    %97 = tpu.concatenate %95, %96 in 1 : vector<8x241xf32>, vector<8x15xf32> -> vector<8x256xf32>
    %98 = vector.extract_strided_slice %0 {offsets = [6, 0], sizes = [1, 256], strides = [1, 1]} : vector<9x256xf32> to vector<1x256xf32>
    %99 = vector.broadcast %98 : vector<1x256xf32> to vector<8x256xf32>
    %100 = arith.mulf %97, %99 : vector<8x256xf32>
    %101 = vector.extract_strided_slice %61 {offsets = [0, 16], sizes = [8, 240], strides = [1, 1]} : vector<8x256xf32> to vector<8x240xf32>
    %102 = vector.extract_strided_slice %61 {offsets = [0, 0], sizes = [8, 16], strides = [1, 1]} : vector<8x256xf32> to vector<8x16xf32>
    %103 = tpu.concatenate %101, %102 in 1 : vector<8x240xf32>, vector<8x16xf32> -> vector<8x256xf32>
    %104 = vector.extract_strided_slice %0 {offsets = [7, 0], sizes = [1, 256], strides = [1, 1]} : vector<9x256xf32> to vector<1x256xf32>
    %105 = vector.broadcast %104 : vector<1x256xf32> to vector<8x256xf32>
    %106 = arith.mulf %103, %105 : vector<8x256xf32>
    %107 = vector.extract_strided_slice %61 {offsets = [0, 17], sizes = [8, 239], strides = [1, 1]} : vector<8x256xf32> to vector<8x239xf32>
    %108 = vector.extract_strided_slice %61 {offsets = [0, 0], sizes = [8, 17], strides = [1, 1]} : vector<8x256xf32> to vector<8x17xf32>
    %109 = tpu.concatenate %107, %108 in 1 : vector<8x239xf32>, vector<8x17xf32> -> vector<8x256xf32>
    %110 = vector.extract_strided_slice %0 {offsets = [8, 0], sizes = [1, 256], strides = [1, 1]} : vector<9x256xf32> to vector<1x256xf32>
    %111 = vector.broadcast %110 : vector<1x256xf32> to vector<8x256xf32>
    %112 = arith.mulf %109, %111 : vector<8x256xf32>
    %113 = tpu.concatenate %67, %73, %79, %85, %88, %94, %100, %106, %112 in 0 : vector<8x256xf32>, vector<8x256xf32>, vector<8x256xf32>, vector<8x256xf32>, vector<8x256xf32>, vector<8x256xf32>, vector<8x256xf32>, vector<8x256xf32>, vector<8x256xf32> -> vector<72x256xf32>
    %c0_9 = arith.constant 0 : index
    %c0_10 = arith.constant 0 : index
    %114 = vector.load %arg5[%c0_9, %c0_10] : memref<16x72xf32, #tpu.memory_space<vmem>>, vector<16x72xf32>
    %cst_11 = arith.constant dense<0.000000e+00> : vector<16x256xf32>
    %115 = tpu.matmul %114, %113, %cst_11 {dimension_numbers = #tpu.dot_dimension_numbers<[1], [0], [0], [1], [0, 0, 1, 1], [], []>} : vector<16x72xf32>, vector<72x256xf32>, vector<16x256xf32> -> vector<16x256xf32>
    %c0_12 = arith.constant 0 : index
    %c0_13 = arith.constant 0 : index
    %116 = vector.load %arg6[%c0_12, %c0_13] : memref<16x1xf32, #tpu.memory_space<vmem>>, vector<16x1xf32>
    %117 = vector.broadcast %116 : vector<16x1xf32> to vector<16x256xf32>
    %118 = arith.addf %115, %117 : vector<16x256xf32>
    %cst_14 = arith.constant 0.000000e+00 : f32
    %119 = vector.broadcast %cst_14 : f32 to vector<16x256xf32>
    %120 = arith.maximumf %118, %119 : vector<16x256xf32>
    %121 = vector.extract_strided_slice %120 {offsets = [0, 239], sizes = [16, 17], strides = [1, 1]} : vector<16x256xf32> to vector<16x17xf32>
    %122 = vector.extract_strided_slice %120 {offsets = [0, 0], sizes = [16, 239], strides = [1, 1]} : vector<16x256xf32> to vector<16x239xf32>
    %123 = tpu.concatenate %121, %122 in 1 : vector<16x17xf32>, vector<16x239xf32> -> vector<16x256xf32>
    %124 = vector.extract_strided_slice %0 {offsets = [0, 0], sizes = [1, 256], strides = [1, 1]} : vector<9x256xf32> to vector<1x256xf32>
    %125 = vector.broadcast %124 : vector<1x256xf32> to vector<16x256xf32>
    %126 = arith.mulf %123, %125 : vector<16x256xf32>
    %127 = vector.extract_strided_slice %120 {offsets = [0, 240], sizes = [16, 16], strides = [1, 1]} : vector<16x256xf32> to vector<16x16xf32>
    %128 = vector.extract_strided_slice %120 {offsets = [0, 0], sizes = [16, 240], strides = [1, 1]} : vector<16x256xf32> to vector<16x240xf32>
    %129 = tpu.concatenate %127, %128 in 1 : vector<16x16xf32>, vector<16x240xf32> -> vector<16x256xf32>
    %130 = vector.extract_strided_slice %0 {offsets = [1, 0], sizes = [1, 256], strides = [1, 1]} : vector<9x256xf32> to vector<1x256xf32>
    %131 = vector.broadcast %130 : vector<1x256xf32> to vector<16x256xf32>
    %132 = arith.mulf %129, %131 : vector<16x256xf32>
    %133 = vector.extract_strided_slice %120 {offsets = [0, 241], sizes = [16, 15], strides = [1, 1]} : vector<16x256xf32> to vector<16x15xf32>
    %134 = vector.extract_strided_slice %120 {offsets = [0, 0], sizes = [16, 241], strides = [1, 1]} : vector<16x256xf32> to vector<16x241xf32>
    %135 = tpu.concatenate %133, %134 in 1 : vector<16x15xf32>, vector<16x241xf32> -> vector<16x256xf32>
    %136 = vector.extract_strided_slice %0 {offsets = [2, 0], sizes = [1, 256], strides = [1, 1]} : vector<9x256xf32> to vector<1x256xf32>
    %137 = vector.broadcast %136 : vector<1x256xf32> to vector<16x256xf32>
    %138 = arith.mulf %135, %137 : vector<16x256xf32>
    %139 = vector.extract_strided_slice %120 {offsets = [0, 255], sizes = [16, 1], strides = [1, 1]} : vector<16x256xf32> to vector<16x1xf32>
    %140 = vector.extract_strided_slice %120 {offsets = [0, 0], sizes = [16, 255], strides = [1, 1]} : vector<16x256xf32> to vector<16x255xf32>
    %141 = tpu.concatenate %139, %140 in 1 : vector<16x1xf32>, vector<16x255xf32> -> vector<16x256xf32>
    %142 = vector.extract_strided_slice %0 {offsets = [3, 0], sizes = [1, 256], strides = [1, 1]} : vector<9x256xf32> to vector<1x256xf32>
    %143 = vector.broadcast %142 : vector<1x256xf32> to vector<16x256xf32>
    %144 = arith.mulf %141, %143 : vector<16x256xf32>
    %145 = vector.extract_strided_slice %0 {offsets = [4, 0], sizes = [1, 256], strides = [1, 1]} : vector<9x256xf32> to vector<1x256xf32>
    %146 = vector.broadcast %145 : vector<1x256xf32> to vector<16x256xf32>
    %147 = arith.mulf %120, %146 : vector<16x256xf32>
    %148 = vector.extract_strided_slice %120 {offsets = [0, 1], sizes = [16, 255], strides = [1, 1]} : vector<16x256xf32> to vector<16x255xf32>
    %149 = vector.extract_strided_slice %120 {offsets = [0, 0], sizes = [16, 1], strides = [1, 1]} : vector<16x256xf32> to vector<16x1xf32>
    %150 = tpu.concatenate %148, %149 in 1 : vector<16x255xf32>, vector<16x1xf32> -> vector<16x256xf32>
    %151 = vector.extract_strided_slice %0 {offsets = [5, 0], sizes = [1, 256], strides = [1, 1]} : vector<9x256xf32> to vector<1x256xf32>
    %152 = vector.broadcast %151 : vector<1x256xf32> to vector<16x256xf32>
    %153 = arith.mulf %150, %152 : vector<16x256xf32>
    %154 = vector.extract_strided_slice %120 {offsets = [0, 15], sizes = [16, 241], strides = [1, 1]} : vector<16x256xf32> to vector<16x241xf32>
    %155 = vector.extract_strided_slice %120 {offsets = [0, 0], sizes = [16, 15], strides = [1, 1]} : vector<16x256xf32> to vector<16x15xf32>
    %156 = tpu.concatenate %154, %155 in 1 : vector<16x241xf32>, vector<16x15xf32> -> vector<16x256xf32>
    %157 = vector.extract_strided_slice %0 {offsets = [6, 0], sizes = [1, 256], strides = [1, 1]} : vector<9x256xf32> to vector<1x256xf32>
    %158 = vector.broadcast %157 : vector<1x256xf32> to vector<16x256xf32>
    %159 = arith.mulf %156, %158 : vector<16x256xf32>
    %160 = vector.extract_strided_slice %120 {offsets = [0, 16], sizes = [16, 240], strides = [1, 1]} : vector<16x256xf32> to vector<16x240xf32>
    %161 = vector.extract_strided_slice %120 {offsets = [0, 0], sizes = [16, 16], strides = [1, 1]} : vector<16x256xf32> to vector<16x16xf32>
    %162 = tpu.concatenate %160, %161 in 1 : vector<16x240xf32>, vector<16x16xf32> -> vector<16x256xf32>
    %163 = vector.extract_strided_slice %0 {offsets = [7, 0], sizes = [1, 256], strides = [1, 1]} : vector<9x256xf32> to vector<1x256xf32>
    %164 = vector.broadcast %163 : vector<1x256xf32> to vector<16x256xf32>
    %165 = arith.mulf %162, %164 : vector<16x256xf32>
    %166 = vector.extract_strided_slice %120 {offsets = [0, 17], sizes = [16, 239], strides = [1, 1]} : vector<16x256xf32> to vector<16x239xf32>
    %167 = vector.extract_strided_slice %120 {offsets = [0, 0], sizes = [16, 17], strides = [1, 1]} : vector<16x256xf32> to vector<16x17xf32>
    %168 = tpu.concatenate %166, %167 in 1 : vector<16x239xf32>, vector<16x17xf32> -> vector<16x256xf32>
    %169 = vector.extract_strided_slice %0 {offsets = [8, 0], sizes = [1, 256], strides = [1, 1]} : vector<9x256xf32> to vector<1x256xf32>
    %170 = vector.broadcast %169 : vector<1x256xf32> to vector<16x256xf32>
    %171 = arith.mulf %168, %170 : vector<16x256xf32>
    %172 = tpu.concatenate %126, %132, %138, %144, %147, %153, %159, %165, %171 in 0 : vector<16x256xf32>, vector<16x256xf32>, vector<16x256xf32>, vector<16x256xf32>, vector<16x256xf32>, vector<16x256xf32>, vector<16x256xf32>, vector<16x256xf32>, vector<16x256xf32> -> vector<144x256xf32>
    %c0_15 = arith.constant 0 : index
    %c0_16 = arith.constant 0 : index
    %173 = vector.load %arg7[%c0_15, %c0_16] : memref<8x144xf32, #tpu.memory_space<vmem>>, vector<8x144xf32>
    %cst_17 = arith.constant dense<0.000000e+00> : vector<8x256xf32>
    %174 = tpu.matmul %173, %172, %cst_17 {dimension_numbers = #tpu.dot_dimension_numbers<[1], [0], [0], [1], [0, 0, 1, 1], [], []>} : vector<8x144xf32>, vector<144x256xf32>, vector<8x256xf32> -> vector<8x256xf32>
    %c0_18 = arith.constant 0 : index
    %c0_19 = arith.constant 0 : index
    %175 = vector.load %arg8[%c0_18, %c0_19] : memref<8x1xf32, #tpu.memory_space<vmem>>, vector<8x1xf32>
    %176 = vector.broadcast %175 : vector<8x1xf32> to vector<8x256xf32>
    %177 = arith.addf %174, %176 : vector<8x256xf32>
    %cst_20 = arith.constant 0.000000e+00 : f32
    %178 = vector.broadcast %cst_20 : f32 to vector<8x256xf32>
    %179 = arith.maximumf %177, %178 : vector<8x256xf32>
    %180 = vector.extract_strided_slice %179 {offsets = [0, 239], sizes = [8, 17], strides = [1, 1]} : vector<8x256xf32> to vector<8x17xf32>
    %181 = vector.extract_strided_slice %179 {offsets = [0, 0], sizes = [8, 239], strides = [1, 1]} : vector<8x256xf32> to vector<8x239xf32>
    %182 = tpu.concatenate %180, %181 in 1 : vector<8x17xf32>, vector<8x239xf32> -> vector<8x256xf32>
    %183 = vector.extract_strided_slice %0 {offsets = [0, 0], sizes = [1, 256], strides = [1, 1]} : vector<9x256xf32> to vector<1x256xf32>
    %184 = vector.broadcast %183 : vector<1x256xf32> to vector<8x256xf32>
    %185 = arith.mulf %182, %184 : vector<8x256xf32>
    %186 = vector.extract_strided_slice %179 {offsets = [0, 240], sizes = [8, 16], strides = [1, 1]} : vector<8x256xf32> to vector<8x16xf32>
    %187 = vector.extract_strided_slice %179 {offsets = [0, 0], sizes = [8, 240], strides = [1, 1]} : vector<8x256xf32> to vector<8x240xf32>
    %188 = tpu.concatenate %186, %187 in 1 : vector<8x16xf32>, vector<8x240xf32> -> vector<8x256xf32>
    %189 = vector.extract_strided_slice %0 {offsets = [1, 0], sizes = [1, 256], strides = [1, 1]} : vector<9x256xf32> to vector<1x256xf32>
    %190 = vector.broadcast %189 : vector<1x256xf32> to vector<8x256xf32>
    %191 = arith.mulf %188, %190 : vector<8x256xf32>
    %192 = vector.extract_strided_slice %179 {offsets = [0, 241], sizes = [8, 15], strides = [1, 1]} : vector<8x256xf32> to vector<8x15xf32>
    %193 = vector.extract_strided_slice %179 {offsets = [0, 0], sizes = [8, 241], strides = [1, 1]} : vector<8x256xf32> to vector<8x241xf32>
    %194 = tpu.concatenate %192, %193 in 1 : vector<8x15xf32>, vector<8x241xf32> -> vector<8x256xf32>
    %195 = vector.extract_strided_slice %0 {offsets = [2, 0], sizes = [1, 256], strides = [1, 1]} : vector<9x256xf32> to vector<1x256xf32>
    %196 = vector.broadcast %195 : vector<1x256xf32> to vector<8x256xf32>
    %197 = arith.mulf %194, %196 : vector<8x256xf32>
    %198 = vector.extract_strided_slice %179 {offsets = [0, 255], sizes = [8, 1], strides = [1, 1]} : vector<8x256xf32> to vector<8x1xf32>
    %199 = vector.extract_strided_slice %179 {offsets = [0, 0], sizes = [8, 255], strides = [1, 1]} : vector<8x256xf32> to vector<8x255xf32>
    %200 = tpu.concatenate %198, %199 in 1 : vector<8x1xf32>, vector<8x255xf32> -> vector<8x256xf32>
    %201 = vector.extract_strided_slice %0 {offsets = [3, 0], sizes = [1, 256], strides = [1, 1]} : vector<9x256xf32> to vector<1x256xf32>
    %202 = vector.broadcast %201 : vector<1x256xf32> to vector<8x256xf32>
    %203 = arith.mulf %200, %202 : vector<8x256xf32>
    %204 = vector.extract_strided_slice %0 {offsets = [4, 0], sizes = [1, 256], strides = [1, 1]} : vector<9x256xf32> to vector<1x256xf32>
    %205 = vector.broadcast %204 : vector<1x256xf32> to vector<8x256xf32>
    %206 = arith.mulf %179, %205 : vector<8x256xf32>
    %207 = vector.extract_strided_slice %179 {offsets = [0, 1], sizes = [8, 255], strides = [1, 1]} : vector<8x256xf32> to vector<8x255xf32>
    %208 = vector.extract_strided_slice %179 {offsets = [0, 0], sizes = [8, 1], strides = [1, 1]} : vector<8x256xf32> to vector<8x1xf32>
    %209 = tpu.concatenate %207, %208 in 1 : vector<8x255xf32>, vector<8x1xf32> -> vector<8x256xf32>
    %210 = vector.extract_strided_slice %0 {offsets = [5, 0], sizes = [1, 256], strides = [1, 1]} : vector<9x256xf32> to vector<1x256xf32>
    %211 = vector.broadcast %210 : vector<1x256xf32> to vector<8x256xf32>
    %212 = arith.mulf %209, %211 : vector<8x256xf32>
    %213 = vector.extract_strided_slice %179 {offsets = [0, 15], sizes = [8, 241], strides = [1, 1]} : vector<8x256xf32> to vector<8x241xf32>
    %214 = vector.extract_strided_slice %179 {offsets = [0, 0], sizes = [8, 15], strides = [1, 1]} : vector<8x256xf32> to vector<8x15xf32>
    %215 = tpu.concatenate %213, %214 in 1 : vector<8x241xf32>, vector<8x15xf32> -> vector<8x256xf32>
    %216 = vector.extract_strided_slice %0 {offsets = [6, 0], sizes = [1, 256], strides = [1, 1]} : vector<9x256xf32> to vector<1x256xf32>
    %217 = vector.broadcast %216 : vector<1x256xf32> to vector<8x256xf32>
    %218 = arith.mulf %215, %217 : vector<8x256xf32>
    %219 = vector.extract_strided_slice %179 {offsets = [0, 16], sizes = [8, 240], strides = [1, 1]} : vector<8x256xf32> to vector<8x240xf32>
    %220 = vector.extract_strided_slice %179 {offsets = [0, 0], sizes = [8, 16], strides = [1, 1]} : vector<8x256xf32> to vector<8x16xf32>
    %221 = tpu.concatenate %219, %220 in 1 : vector<8x240xf32>, vector<8x16xf32> -> vector<8x256xf32>
    %222 = vector.extract_strided_slice %0 {offsets = [7, 0], sizes = [1, 256], strides = [1, 1]} : vector<9x256xf32> to vector<1x256xf32>
    %223 = vector.broadcast %222 : vector<1x256xf32> to vector<8x256xf32>
    %224 = arith.mulf %221, %223 : vector<8x256xf32>
    %225 = vector.extract_strided_slice %179 {offsets = [0, 17], sizes = [8, 239], strides = [1, 1]} : vector<8x256xf32> to vector<8x239xf32>
    %226 = vector.extract_strided_slice %179 {offsets = [0, 0], sizes = [8, 17], strides = [1, 1]} : vector<8x256xf32> to vector<8x17xf32>
    %227 = tpu.concatenate %225, %226 in 1 : vector<8x239xf32>, vector<8x17xf32> -> vector<8x256xf32>
    %228 = vector.extract_strided_slice %0 {offsets = [8, 0], sizes = [1, 256], strides = [1, 1]} : vector<9x256xf32> to vector<1x256xf32>
    %229 = vector.broadcast %228 : vector<1x256xf32> to vector<8x256xf32>
    %230 = arith.mulf %227, %229 : vector<8x256xf32>
    %231 = tpu.concatenate %185, %191, %197, %203, %206, %212, %218, %224, %230 in 0 : vector<8x256xf32>, vector<8x256xf32>, vector<8x256xf32>, vector<8x256xf32>, vector<8x256xf32>, vector<8x256xf32>, vector<8x256xf32>, vector<8x256xf32>, vector<8x256xf32> -> vector<72x256xf32>
    %c0_21 = arith.constant 0 : index
    %c0_22 = arith.constant 0 : index
    %232 = vector.load %arg9[%c0_21, %c0_22] : memref<4x72xf32, #tpu.memory_space<vmem>>, vector<4x72xf32>
    %cst_23 = arith.constant dense<0.000000e+00> : vector<4x256xf32>
    %233 = tpu.matmul %232, %231, %cst_23 {dimension_numbers = #tpu.dot_dimension_numbers<[1], [0], [0], [1], [0, 0, 1, 1], [], []>} : vector<4x72xf32>, vector<72x256xf32>, vector<4x256xf32> -> vector<4x256xf32>
    %c0_24 = arith.constant 0 : index
    %c0_25 = arith.constant 0 : index
    %234 = vector.load %arg10[%c0_24, %c0_25] : memref<4x1xf32, #tpu.memory_space<vmem>>, vector<4x1xf32>
    %235 = vector.broadcast %234 : vector<4x1xf32> to vector<4x256xf32>
    %236 = arith.addf %233, %235 : vector<4x256xf32>
    %237 = arith.negf %236 : vector<4x256xf32>
    %238 = math.exp %237 : vector<4x256xf32>
    %cst_26 = arith.constant 1.000000e+00 : f32
    %239 = vector.broadcast %cst_26 : f32 to vector<4x256xf32>
    %240 = arith.addf %239, %238 : vector<4x256xf32>
    %241 = arith.divf %239, %240 : vector<4x256xf32>
    %c0_27 = arith.constant 0 : index
    %c0_28 = arith.constant 0 : index
    %c0_29 = arith.constant 0 : index
    %242 = vector.load %arg11[%c0_27, %c0_28, %c0_29] : memref<1x4x256xf32, #tpu.memory_space<vmem>>, vector<1x4x256xf32>
    %243 = vector.shape_cast %242 : vector<1x4x256xf32> to vector<4x256xf32>
    %244 = vector.shape_cast %241 : vector<4x256xf32> to vector<1x4x256xf32>
    tpu.vector_store %arg11[%c0_27, %c0_28, %c0_29], %244 {strides = array<i32>} : memref<1x4x256xf32, #tpu.memory_space<vmem>>, vector<1x4x256xf32>,
    return
  }
  func.func @transform_0(%arg0: i32) -> (i32, i32, i32) {
    %c0_i32 = arith.constant 0 : i32
    %c0_i32_0 = arith.constant 0 : i32
    %c0_i32_1 = arith.constant 0 : i32
    return %arg0, %c0_i32, %c0_i32_0 : i32, i32, i32
  }
  func.func @transform_1(%arg0: i32) -> (i32, i32) {
    %c0_i32 = arith.constant 0 : i32
    %c0_i32_0 = arith.constant 0 : i32
    %c0_i32_1 = arith.constant 0 : i32
    return %c0_i32, %c0_i32_0 : i32, i32
  }
  func.func @transform_2(%arg0: i32) -> (i32, i32) {
    %c0_i32 = arith.constant 0 : i32
    %c0_i32_0 = arith.constant 0 : i32
    %c0_i32_1 = arith.constant 0 : i32
    return %c0_i32, %c0_i32_0 : i32, i32
  }
  func.func @transform_3(%arg0: i32) -> (i32, i32) {
    %c0_i32 = arith.constant 0 : i32
    %c0_i32_0 = arith.constant 0 : i32
    %c0_i32_1 = arith.constant 0 : i32
    return %c0_i32, %c0_i32_0 : i32, i32
  }
  func.func @transform_4(%arg0: i32) -> (i32, i32) {
    %c0_i32 = arith.constant 0 : i32
    %c0_i32_0 = arith.constant 0 : i32
    %c0_i32_1 = arith.constant 0 : i32
    return %c0_i32, %c0_i32_0 : i32, i32
  }
  func.func @transform_5(%arg0: i32) -> (i32, i32) {
    %c0_i32 = arith.constant 0 : i32
    %c0_i32_0 = arith.constant 0 : i32
    %c0_i32_1 = arith.constant 0 : i32
    return %c0_i32, %c0_i32_0 : i32, i32
  }
  func.func @transform_6(%arg0: i32) -> (i32, i32) {
    %c0_i32 = arith.constant 0 : i32
    %c0_i32_0 = arith.constant 0 : i32
    %c0_i32_1 = arith.constant 0 : i32
    return %c0_i32, %c0_i32_0 : i32, i32
  }
  func.func @transform_7(%arg0: i32) -> (i32, i32) {
    %c0_i32 = arith.constant 0 : i32
    %c0_i32_0 = arith.constant 0 : i32
    %c0_i32_1 = arith.constant 0 : i32
    return %c0_i32, %c0_i32_0 : i32, i32
  }
  func.func @transform_8(%arg0: i32) -> (i32, i32) {
    %c0_i32 = arith.constant 0 : i32
    %c0_i32_0 = arith.constant 0 : i32
    %c0_i32_1 = arith.constant 0 : i32
    return %c0_i32, %c0_i32_0 : i32, i32
  }
  func.func @transform_9(%arg0: i32) -> (i32, i32) {
    %c0_i32 = arith.constant 0 : i32
    %c0_i32_0 = arith.constant 0 : i32
    %c0_i32_1 = arith.constant 0 : i32
    return %c0_i32, %c0_i32_0 : i32, i32
  }
  func.func @transform_10(%arg0: i32) -> (i32, i32, i32) {
    %c0_i32 = arith.constant 0 : i32
    %c0_i32_0 = arith.constant 0 : i32
    %c0_i32_1 = arith.constant 0 : i32
    return %arg0, %c0_i32, %c0_i32_0 : i32, i32, i32
  }
}

</mosaic_0001>

<bundles_post_ra>
// kernel: autoencoder_forward.1
= control target key start
LH: loop header
LB: loop body
LE: loop exit
PB: predicated region body
PF: predicated region fallthrough
CT: control target
= control target key end

     0   :  { %s1449_s13 = smov 0   ;;  %s1988_s0 = inlined_call_operand.vmem [shape: f32[2,4,256], index: 0, kind: input, shape index: {}]   ;;  %s1989_s1 = inlined_call_operand.vmem [shape: f32[9,256], index: 1, kind: input, shape index: {}]   ;;  %s1990_s2 = inlined_call_operand.vmem [shape: f32[8,36], index: 2, kind: input, shape index: {}]   ;;  %s1991_s3 = inlined_call_operand.vmem [shape: f32[8,1], index: 3, kind: input, shape index: {}]   ;;  %s1992_s4 = inlined_call_operand.vmem [shape: f32[16,72], index: 4, kind: input, shape index: {}]   ;;  %s1993_s5 = inlined_call_operand.vmem [shape: f32[16,1], index: 5, kind: input, shape index: {}]   ;;  %s1994_s6 = inlined_call_operand.vmem [shape: f32[8,144], index: 6, kind: input, shape index: {}]   ;;  %s1995_s7 = inlined_call_operand.vmem [shape: f32[8,1], index: 7, kind: input, shape index: {}]   ;;  %s1996_s8 = inlined_call_operand.vmem [shape: f32[4,72], index: 8, kind: input, shape index: {}]   ;;  %s1997_s9 = inlined_call_operand.vmem [shape: f32[4,1], index: 9, kind: input, shape index: {}]   ;;  %s1998_s10 = inlined_call_operand.vmem [shape: f32[2,4,256], index: 10, kind: output, shape index: {}]  }
   0x1 LB: > { %s1321_s14 = sadd.s32 4294967295, %s1383_s13   ;;  %p1325_p0 = scmp.ge.s32.totalorder %s1383_s13, 1  ;;  %s1383_s13 = sphi %s1449_s13, %s20_s13  }
   0x2   : > { %p312_p1 = scmp.lt.s32.totalorder %s1383_s13, 3 }
   0x4   : > { %p313_p2 = pnand %p1325_p0, %p312_p1 }
   0x5   : > { %p350_p3 = scmp.lt.s32.totalorder (!%p313_p2), %s1321_s14, 1  ;;  %s1385_s19 = smov (!%p313_p2), 16  }
   0x6   : > { %316 = sbr.rel (%p313_p2) target bundleno = 1350 (0x546), region = 60  ;;  %s1386_s20 = smov (!%p313_p2), 15  }
   0x7   : > { %s1387_s21 = smov (!%p313_p2), 1   ;;  %s1388_s22 = smov (!%p313_p2), 127  }
   0x8   : > { %s1389_s23 = smov (!%p313_p2), 113   ;;  %s1390_s24 = smov (!%p313_p2), 112  }
   0x9   : > { %s1391_s25 = smov (!%p313_p2), 111   ;;  %s1392_s26 = smov (!%p313_p2), 17  }
   0xb   : > { %s2000_s14 = smov (!%p350_p3, %s1321_s14), 1  ;;  %v1521_v26 = vld [vmem:[%s1989_s1 + $0x8] sm:$0xff]  ;;  %v1529_v28 = vld [vmem:[%s1989_s1] sm:$0xff]  ;;  %vm455_vm0 = vcmask 1043456   ;;  %vm529_vm1 = vcmask 908288   ;;  %v1393_v50 = vmov 0  }
   0xc   : > { %s1346_s15 = sshll.u32 %s2000_s14, 3  ;;  %v1524_v27 = vperm.slane %v1521_v26, 4  ;;  %v1532_v29 = vperm.slane %v1529_v28, 4  ;;  %v582_v48 = vld [vmem:[%s1991_s3] sm:$0xff]  ;;  %v1552_v49 = vld [vmem:[%s1989_s1 + $0x18] ss:$0 sm:$0xff]  ;;  %1365 = vset.pattern.permute.xlu0 %v1393_v50  ;;  %1366 = vset.pattern.permute.xlu1 %v1393_v50 }
   0xd   : > { %s354_s18 = scalar_lea.vmem %s1988_s0, %s1346_s15  ;;  %vm466_vm2 = vcmask 1039360   ;;  %vm441_vm3 = vcmask 7168   ;;  %v1557_v55 = vperm.slane %v1521_v26, 5  ;;  %v1562_v57 = vperm.slane %v1521_v26, 3 }
   0xe   : > { %v1465_v0 = vld [vmem:[%s354_s18] sm:$0xff]  ;;  %v454_v30 = vrot.slane %v1524_v27, 4  ;;  %vm487_vm4 = vcmask 924672   ;;  %vm508_vm5 = vcmask 916480   ;;  %v1565_v58 = vperm.slane %v1521_v26, 7 }
   0xf   : > { %366 = vst [vmem:[#allocation1] ss:$2 sm:$0xff] %v1465_v0  ;;  %vm420_vm6 = vcmask 121856   ;;  %v1570_v61 = vperm.slane %v1521_v26, 6  ;;  %vm399_vm7 = vcmask 130048   ;;  %vm378_vm8 = vcmask 138240  }
  0x10   : > { %v456_v33 = vsel %vm455_vm0, %v1532_v29, %v454_v30  ;;  %vm588_vm9 = vcmask 293888   ;;  %vm746_vm10 = vcmask 588800  }
  0x11   : > { %v458_v34 = vmul.f32 %v456_v33, %v1465_v0 }
  0x16   : > { %v1468_v1 = vld.sshfl [vmem:[#allocation1 + $0x8] sm:$0xff pattern:$0x75316420] }
  0x17   : > { %371 = vst [vmem:[#allocation1] ss:$2 sm:$0xff] %v1465_v0 }
  0x1e   : > { %v1471_v2 = vld.sshfl [vmem:[#allocation1] sm:$0xff pattern:$0x75316420]  ;;  %v1473_v3 = vld.sshfl [vmem:[#allocation1 + $0x8] sm:$0xff pattern:$0x75316420] }
  0x1f   : > { %387 = vst [vmem:[#allocation1] ss:$2 sm:$0xff] %v1465_v0 }
  0x26   : > { %v388_v4 = vld.sshfl [vmem:[#allocation1 + $0x8] sm:$0xff pattern:$0x75316420] }
  0x27   : > { %389 = vrot.lane.b32.xlu0 %v388_v4, %s1385_s19  ;;  %392 = vst [vmem:[#allocation1] ss:$2 sm:$0xff] %v1465_v0 }
  0x2e   : > { %v393_v5 = vld.sshfl [vmem:[#allocation1] sm:$0xff pattern:$0x75316420]  ;;  %v394_v6 = vld.sshfl [vmem:[#allocation1 + $0x8] sm:$0xff pattern:$0x75316420] }
  0x2f   : > { %395 = vrot.lane.b32.xlu1 %v393_v5, %s1385_s19  ;;  %408 = vst [vmem:[#allocation1] ss:$2 sm:$0xff] %v1465_v0  ;;  %397 = vrot.lane.b32.xlu2 %v394_v6, %s1385_s19 }
  0x36   : > { %v409_v7 = vld.sshfl [vmem:[#allocation1 + $0x8] sm:$0xff pattern:$0x75316420] }
  0x37   : > { %410 = vrot.lane.b32.xlu0 %v409_v7, %s1386_s20  ;;  %413 = vst [vmem:[#allocation1] ss:$2 sm:$0xff] %v1465_v0 }
  0x3e   : > { %v414_v8 = vld.sshfl [vmem:[#allocation1] sm:$0xff pattern:$0x75316420]  ;;  %v415_v9 = vld.sshfl [vmem:[#allocation1 + $0x8] sm:$0xff pattern:$0x75316420] }
  0x3f   : > { %416 = vrot.lane.b32.xlu1 %v414_v8, %s1386_s20  ;;  %429 = vst [vmem:[#allocation1] ss:$2 sm:$0xff] %v1465_v0  ;;  %418 = vrot.lane.b32.xlu2 %v415_v9, %s1386_s20  ;;  %v1586_v8 = vperm.slane %v1529_v28, 5 }
  0x46   : > { %v430_v10 = vld.sshfl [vmem:[#allocation1 + $0x8] sm:$0xff pattern:$0x75316420] }
  0x47   : > { %431 = vrot.lane.b32.xlu0 %v430_v10, %s1387_s21  ;;  %434 = vst [vmem:[#allocation1] ss:$2 sm:$0xff] %v1465_v0 }
  0x4e   : > { %v435_v11 = vld.sshfl [vmem:[#allocation1] sm:$0xff pattern:$0x75316420]  ;;  %v436_v12 = vld.sshfl [vmem:[#allocation1 + $0x8] sm:$0xff pattern:$0x75316420] }
  0x4f   : > { %437 = vrot.lane.b32.xlu1 %v435_v11, %s1387_s21  ;;  %459 = vst [vmem:[#allocation1] ss:$2 sm:$0xff] %v1465_v0  ;;  %439 = vrot.lane.b32.xlu2 %v436_v12, %s1387_s21 }
  0x56   : > { %v460_v13 = vld.sshfl [vmem:[#allocation1] sm:$0xff pattern:$0x75316420]  ;;  %v461_v14 = vld.sshfl [vmem:[#allocation1 + $0x8] sm:$0xff pattern:$0x75316420] }
  0x57   : > { %462 = vrot.lane.b32.xlu0 %v460_v13, %s1388_s22  ;;  %464 = vrot.lane.b32.xlu1 %v461_v14, %s1388_s22  ;;  %470 = vst [vmem:[#allocation1] ss:$2 sm:$0xff] %v1465_v0  ;;  %v1591_v13 = vperm.slane %v1529_v28, 3 }
  0x5e   : > { %v471_v15 = vld.sshfl [vmem:[#allocation1] sm:$0xff pattern:$0x75316420] }
  0x5f   : > { %480 = vst [vmem:[#allocation1] ss:$2 sm:$0xff] %v1465_v0  ;;  %472 = vrot.lane.b32.xlu2 %v471_v15, %s1388_s22 }
  0x66   : > { %v481_v16 = vld.sshfl [vmem:[#allocation1] sm:$0xff pattern:$0x75316420]  ;;  %v482_v17 = vld.sshfl [vmem:[#allocation1 + $0x8] sm:$0xff pattern:$0x75316420] }
  0x67   : > { %483 = vrot.lane.b32.xlu0 %v481_v16, %s1389_s23  ;;  %485 = vrot.lane.b32.xlu1 %v482_v17, %s1389_s23  ;;  %491 = vst [vmem:[#allocation1] ss:$2 sm:$0xff] %v1465_v0 }
  0x6e   : > { %v492_v18 = vld.sshfl [vmem:[#allocation1] sm:$0xff pattern:$0x75316420] }
  0x6f   : > { %501 = vst [vmem:[#allocation1] ss:$2 sm:$0xff] %v1465_v0  ;;  %493 = vrot.lane.b32.xlu2 %v492_v18, %s1389_s23 }
  0x76   : > { %v502_v19 = vld.sshfl [vmem:[#allocation1] sm:$0xff pattern:$0x75316420]  ;;  %v503_v20 = vld.sshfl [vmem:[#allocation1 + $0x8] sm:$0xff pattern:$0x75316420] }
  0x77   : > { %504 = vrot.lane.b32.xlu0 %v502_v19, %s1390_s24  ;;  %512 = vst [vmem:[#allocation1] ss:$2 sm:$0xff] %v1465_v0 }
  0x7e   : > { %v513_v21 = vld.sshfl [vmem:[#allocation1] sm:$0xff pattern:$0x75316420] }
  0x7f   : > { %506 = vrot.lane.b32.xlu0 %v503_v20, %s1390_s24  ;;  %514 = vrot.lane.b32.xlu1 %v513_v21, %s1390_s24  ;;  %522 = vst [vmem:[#allocation1] ss:$2 sm:$0xff] %v1465_v0  ;;  %v1600_v20 = vld [vmem:[%s1989_s1 + $0x10] ss:$0 sm:$0xff] }
  0x86   : > { %v523_v22 = vld.sshfl [vmem:[#allocation1] sm:$0xff pattern:$0x75316420]  ;;  %v524_v23 = vld.sshfl [vmem:[#allocation1 + $0x8] sm:$0xff pattern:$0x75316420] }
  0x87   : > { %525 = vrot.lane.b32.xlu1 %v523_v22, %s1391_s25  ;;  %368 = vrot.lane.b32.xlu0 %v1468_v1, %s1392_s26  ;;  %533 = vst [vmem:[#allocation1] ss:$2 sm:$0xff] %v1465_v0  ;;  %v1574_v1 = vperm.slane %v1529_v28, 7  ;;  %v1604_v22 = vperm.slane %v1529_v28, 6 }
  0x88   : > { %527 = vrot.lane.b32.xlu2 %v524_v23, %s1391_s25  ;;  %v1607_v23 = vperm.slane %v1529_v28, 1 }
  0x89   : > { %v1516_v25 = vpop.permute.xlu2 %397 }
  0x8e   : > { %v534_v24 = vld.sshfl [vmem:[#allocation1] sm:$0xff pattern:$0x75316420] }
  0x8f   : > { %374 = vrot.lane.b32.xlu1 %v1471_v2, %s1392_s26  ;;  %556 = vst [vmem:[#allocation1] ss:$2 sm:$0xff] %v458_v34  ;;  %585 = vperm.xlu0 %1365, %v582_v48   ;;  %v1615_v34 = vperm.slane %v1529_v28, 2 }
  0x90   : > { %535 = vrot.lane.b32.xlu2 %v534_v24, %s1391_s25  ;;  %v1610_v24 = vperm.slane %v1521_v26, 1 }
  0x96   : > { %v558_v15 = vld.sshfl [vmem:[#allocation1 + $0x8] sm:$0xff pattern:$0x75316420]  ;;  %v557_v48 = vld.sshfl [vmem:[#allocation1] sm:$0xff pattern:$0x75316420] }
  0x98   : > { %376 = vrot.lane.b32.xlu2 %v1473_v3, %s1392_s26  ;;  %v1578_v3 = vperm.slane %v1521_v26, 2 }
  0x99   : > { %v1535_v31 = vpop.permute.xlu0 %389  ;;  %v419_v32 = vpop.permute.xlu2 %418 }
  0xa1   : > { %v1540_v35 = vpop.permute.xlu1 %395 }
  0xa9   : > { %v1542_v36 = vpop.permute.xlu0 %410  ;;  %v440_v37 = vpop.permute.xlu2 %439 }
  0xb1   : > { %v1544_v38 = vpop.permute.xlu1 %416 }
  0xb2   : > { %v421_v7 = vsel %vm420_vm6, %v1544_v38, %v419_v32 }
  0xb3   : > { %v428_v16 = vmul.f32 %v1578_v3, %v421_v7 }
  0xb9   : > { %v432_v39 = vpop.permute.xlu0 %431  ;;  %v473_v40 = vpop.permute.xlu2 %472 }
  0xc1   : > { %v438_v41 = vpop.permute.xlu1 %437 }
  0xc2   : > { %v442_v59 = vsel %vm441_vm3, %v438_v41, %v440_v37  ;;  %v445_v17 = vsel %vm441_vm3, %v432_v39, %v438_v41  ;;  %v403_v41 = vsel %vm399_vm7, %v1535_v31, %v1540_v35 }
  0xc3   : > { %v449_v4 = vmul.f32 %v1562_v57, %v442_v59  ;;  %v448_v37 = vmul.f32 %v1591_v13, %v445_v17  ;;  %v406_v31 = vmul.f32 %v1607_v23, %v403_v41 }
  0xc5   : > { %v552_v18 = vrot.slane %v449_v4, 4 }
  0xc9   : > { %v463_v42 = vpop.permute.xlu0 %462  ;;  %v494_v43 = vpop.permute.xlu2 %493 }
  0xca   : > { %v465_v44 = vpop.permute.xlu1 %464 }
  0xcb   : > { %v475_v56 = vsel %vm466_vm2, %v465_v44, %v473_v40  ;;  %v467_v9 = vsel %vm466_vm2, %v463_v42, %v465_v44  ;;  %v424_v42 = vsel %vm420_vm6, %v1542_v36, %v1544_v38  ;;  %v551_v36 = vrot.slane %v448_v37, 4 }
  0xcc   : > { %v479_v60 = vmul.f32 %v1557_v55, %v475_v56  ;;  %v478_v21 = vmul.f32 %v1586_v8, %v467_v9  ;;  %v427_v50 = vmul.f32 %v1615_v34, %v424_v42 }
  0xce   : > { %v564_v10 = vrot.slane %v479_v60, 4 }
  0xd0   : > { %v578_v33 = vsel %vm455_vm0, %v558_v15, %v564_v10  ;;  %v735_v15 = vld [vmem:[%s1993_s5 + $0x8] sm:$0xff] }
  0xd9   : > { %v484_v45 = vpop.permute.xlu0 %483  ;;  %v486_v47 = vpop.permute.xlu1 %485 }
  0xda   : > { %v496_v0 = vsel %vm487_vm4, %v486_v47, %v494_v43  ;;  %v488_v30 = vsel %vm487_vm4, %v484_v45, %v486_v47  ;;  %v576_v43 = vsel %vm455_vm0, %v428_v16, %v552_v18  ;;  %v400_v45 = vsel %vm399_vm7, %v1540_v35, %v1516_v25 }
  0xdb   : > { %v500_v11 = vmul.f32 %v1570_v61, %v496_v0  ;;  %v563_v47 = vrot.slane %v478_v21, 4  ;;  %v1637_v25 = vperm.slane %v1529_v28, 0  ;;  %v1640_v35 = vperm.slane %v1521_v26, 0  ;;  %v581_v26 = vld [vmem:[%s1990_s2] sm:$0xff] }
  0xe2   : > { %v528_v46 = vpop.permute.xlu2 %527 }
  0xe9   : > { %v505_v51 = vpop.permute.xlu0 %504 }
  0xea   : > { %v536_v52 = vpop.permute.xlu2 %535 }
  0xeb   : > { %v538_v53 = vsel %vm529_vm1, %v528_v46, %v536_v52 }
  0xec   : > { %v542_v54 = vmul.f32 %v1552_v49, %v538_v53 }
  0xee   : > { %1332 = vmatpush.msk.msra.mxu1 %vm455_vm0, %v542_v54  ;;  %v577_v54 = vsel %vm455_vm0, %v557_v48, %v563_v47 }
  0xf1   : > { %v507_v62 = vpop.permute.xlu0 %506  ;;  %v515_v63 = vpop.permute.xlu1 %514 }
  0xf2   : > { %v517_v2 = vsel %vm508_vm5, %v507_v62, %v515_v63  ;;  %v509_v5 = vsel %vm508_vm5, %v505_v51, %v507_v62  ;;  %v407_v51 = vmul.f32 %v1610_v24, %v400_v45  ;;  %v377_v53 = vpop.permute.xlu2 %376  ;;  %v575_v62 = vsel %vm455_vm0, %v427_v50, %v551_v36 }
  0xf3   : > { %v521_v6 = vmul.f32 %v1565_v58, %v517_v2  ;;  %v520_v14 = vmul.f32 %v1574_v1, %v509_v5  ;;  %v545_v63 = vrot.slane %v406_v31, 4 }
  0xf4   : > { %v546_v0 = vrot.slane %v407_v51, 4 }
  0xf5   : > { %v570_v12 = vrot.slane %v521_v6, 4  ;;  %v569_v39 = vrot.slane %v520_v14, 4 }
  0xf7   : > { %v580_v19 = vsel %vm455_vm0, %v500_v11, %v570_v12 }
  0xf8   : > { %630 = vmatpush.msra.mxu1 %v580_v19 }
  0xf9   : > { %v526_v32 = vpop.permute.xlu1 %525  ;;  %v369_v52 = vpop.permute.xlu0 %368 }
  0xfa   : > { %v530_v40 = vsel %vm529_vm1, %v526_v32, %v528_v46  ;;  %631 = vmatpush.msra.mxu1 %v578_v33  ;;  %v499_v46 = vmul.f32 %v1604_v22, %v488_v30 }
  0xfb   : > { %v541_v44 = vmul.f32 %v1600_v20, %v530_v40 }
  0xfc   : > { %632 = vmatpush.msra.mxu1 %v576_v43  ;;  %v579_v38 = vsel %vm455_vm0, %v499_v46, %v569_v39  ;;  %v734_v46 = vld [vmem:[%s1993_s5] sm:$0xff] }
  0xfd   : > { %1330 = vmatpush.msk.msra.mxu0 %vm455_vm0, %v541_v44 }
  0xff   : > { %610 = vmatpush.msra.mxu0 %v579_v38 }
 0x101   : > { %v375_v56 = vpop.permute.xlu1 %374  ;;  %611 = vmatpush.msra.mxu0 %v577_v54  ;;  %v586_v6 = vpop.permute.xlu0 %585 }
 0x102   : > { %v382_v59 = vsel %vm378_vm8, %v369_v52, %v375_v56  ;;  %v379_v60 = vsel %vm378_vm8, %v375_v56, %v377_v53 }
 0x103   : > { %v385_v2 = vmul.f32 %v1637_v25, %v382_v59  ;;  %v386_v28 = vmul.f32 %v1640_v35, %v379_v60  ;;  %612 = vmatpush.msra.mxu0 %v575_v62 }
 0x105   : > { %v573_v4 = vsel %vm455_vm0, %v385_v2, %v545_v63  ;;  %v574_v5 = vsel %vm455_vm0, %v386_v28, %v546_v0 }
 0x106   : > { %613 = vmatpush.msra.mxu0 %v573_v4  ;;  %633 = vmatpush.msra.mxu1 %v574_v5 }
 0x107   : > { %1331 = vmatmul.msk.f32.vlgmr.msra.gmra.mxu0 %vm588_vm9, %v581_v26  ;;  %1333 = vmatmul.msk.f32.vlgmr.msra.gmra.mxu1 %vm588_vm9, %v581_v26 }
 0x184   : > { %v615_v7 = vpop.f32.mrf.mxu0  ;;  %v635_v11 = vpop.f32.mrf.mxu1 }
 0x185   : > { %v616_v9 = vadd.f32 %v615_v7, %v586_v6  ;;  %v636_v12 = vadd.f32 %v635_v11, %v586_v6 }
 0x187   : > { %v638_v10 = vmax.f32 %v616_v9, 0.0  ;;  %v639_v14 = vmax.f32 %v636_v12, 0.0 }
 0x189   : > { %688 = vrot.lane.b32.xlu2 %v638_v10, %s1388_s22  ;;  %699 = vrot.lane.b32.xlu0 %v638_v10, %s1389_s23  ;;  %v687_v60 = vmul.f32 %v639_v14, %v1524_v27  ;;  %v686_v62 = vmul.f32 %v638_v10, %v1532_v29 }
 0x18a   : > { %721 = vrot.lane.b32.xlu1 %v638_v10, %s1391_s25 }
 0x191   : > { %678 = vrot.lane.b32.xlu2 %v638_v10, %s1387_s21  ;;  %690 = vrot.lane.b32.xlu0 %v639_v14, %s1388_s22 }
 0x192   : > { %710 = vrot.lane.b32.xlu1 %v638_v10, %s1390_s24 }
 0x199   : > { %723 = vrot.lane.b32.xlu2 %v639_v14, %s1391_s25  ;;  %664 = vrot.lane.b32.xlu0 %v639_v14, %s1386_s20 }
 0x19a   : > { %667 = vrot.lane.b32.xlu1 %v638_v10, %s1386_s20 }
 0x1a1   : > { %712 = vrot.lane.b32.xlu2 %v639_v14, %s1390_s24  ;;  %656 = vrot.lane.b32.xlu0 %v638_v10, %s1385_s19 }
 0x1a2   : > { %701 = vrot.lane.b32.xlu1 %v639_v14, %s1389_s23 }
 0x1a9   : > { %653 = vrot.lane.b32.xlu2 %v639_v14, %s1385_s19  ;;  %743 = vperm.xlu0 %1365, %v735_v15  }
 0x1aa   : > { %675 = vrot.lane.b32.xlu1 %v639_v14, %s1387_s21 }
 0x1b1   : > { %645 = vrot.lane.b32.xlu2 %v638_v10, %s1392_s26 }
 0x1b2   : > { %641 = vrot.lane.b32.xlu1 %v639_v14, %s1392_s26 }
 0x1ba   : > { %738 = vperm.xlu1 %1366, %v734_v46  }
 0x1e3   : > { %v689_v16 = vpop.permute.xlu2 %688 }
 0x1eb   : > { %v679_v17 = vpop.permute.xlu2 %678 }
 0x1f3   : > { %v724_v18 = vpop.permute.xlu2 %723 }
 0x1fb   : > { %v700_v32 = vpop.permute.xlu0 %699  ;;  %v713_v39 = vpop.permute.xlu2 %712 }
 0x1fc   : > { %v722_v19 = vpop.permute.xlu1 %721 }
 0x1fd   : > { %v725_v21 = vsel %vm529_vm1, %v722_v19, %v724_v18  ;;  %v729_v30 = vsel %vm529_vm1, %v724_v18, %v722_v19 }
 0x1fe   : > { %v730_v33 = vmul.f32 %v1600_v20, %v725_v21  ;;  %v731_v37 = vmul.f32 %v1552_v49, %v729_v30  ;;  %v732_v30 = vld [vmem:[%s1992_s4] sm:$0xff] }
 0x200   : > { %760 = vmatpush.msra.mxu2 %v730_v33  ;;  %783 = vmatpush.msra.mxu3 %v731_v37 }
 0x203   : > { %v691_v45 = vpop.permute.xlu0 %690  ;;  %v654_v59 = vpop.permute.xlu2 %653 }
 0x204   : > { %v711_v40 = vpop.permute.xlu1 %710  ;;  %v692_v50 = vsel %vm466_vm2, %v689_v16, %v691_v45  ;;  %v696_v36 = vsel %vm466_vm2, %v691_v45, %v689_v16 }
 0x205   : > { %v714_v41 = vsel %vm508_vm5, %v711_v40, %v713_v39  ;;  %v718_v42 = vsel %vm508_vm5, %v713_v39, %v711_v40  ;;  %v697_v54 = vmul.f32 %v692_v50, %v1586_v8  ;;  %v698_v56 = vmul.f32 %v696_v36, %v1557_v55  ;;  %v989_v36 = vld [vmem:[%s1995_s7] sm:$0xff] }
 0x206   : > { %v719_v43 = vmul.f32 %v714_v41, %v1574_v1  ;;  %v720_v44 = vmul.f32 %v718_v42, %v1565_v58 }
 0x208   : > { %761 = vmatpush.msra.mxu2 %v719_v43  ;;  %784 = vmatpush.msra.mxu3 %v720_v44 }
 0x20b   : > { %v665_v48 = vpop.permute.xlu0 %664  ;;  %v646_v15 = vpop.permute.xlu2 %645 }
 0x20c   : > { %v668_v47 = vpop.permute.xlu1 %667 }
 0x20d   : > { %v669_v2 = vsel %vm420_vm6, %v668_v47, %v665_v48  ;;  %v672_v28 = vsel %vm420_vm6, %v665_v48, %v668_v47 }
 0x20e   : > { %v673_v10 = vmul.f32 %v672_v28, %v1615_v34  ;;  %v674_v11 = vmul.f32 %v669_v2, %v1578_v3 }
 0x213   : > { %v657_v63 = vpop.permute.xlu0 %656 }
 0x214   : > { %v702_v31 = vpop.permute.xlu1 %701  ;;  %v658_v7 = vsel %vm399_vm7, %v657_v63, %v654_v59  ;;  %v661_v9 = vsel %vm399_vm7, %v654_v59, %v657_v63 }
 0x215   : > { %v703_v38 = vsel %vm487_vm4, %v700_v32, %v702_v31  ;;  %v707_v51 = vsel %vm487_vm4, %v702_v31, %v700_v32  ;;  %v663_v12 = vmul.f32 %v658_v7, %v1610_v24  ;;  %v662_v14 = vmul.f32 %v661_v9, %v1607_v23  ;;  %v733_v32 = vld [vmem:[%s1992_s4 + $0x8] sm:$0xff] }
 0x216   : > { %v708_v52 = vmul.f32 %v703_v38, %v1604_v22  ;;  %v709_v53 = vmul.f32 %v707_v51, %v1570_v61 }
 0x218   : > { %762 = vmatpush.msra.mxu2 %v708_v52  ;;  %785 = vmatpush.msra.mxu3 %v709_v53 }
 0x21a   : > { %763 = vmatpush.msra.mxu2 %v697_v54  ;;  %786 = vmatpush.msra.mxu3 %v698_v56 }
 0x21b   : > { %v744_v45 = vpop.permute.xlu0 %743 }
 0x21c   : > { %787 = vmatpush.msra.mxu3 %v687_v60  ;;  %v676_v0 = vpop.permute.xlu1 %675  ;;  %764 = vmatpush.msra.mxu2 %v686_v62 }
 0x21d   : > { %v680_v26 = vsel %vm441_vm3, %v679_v17, %v676_v0  ;;  %v683_v4 = vsel %vm441_vm3, %v676_v0, %v679_v17 }
 0x21e   : > { %v684_v5 = vmul.f32 %v683_v4, %v1591_v13  ;;  %v685_v6 = vmul.f32 %v680_v26, %v1562_v57 }
 0x220   : > { %765 = vmatpush.msra.mxu2 %v684_v5  ;;  %788 = vmatpush.msra.mxu3 %v685_v6 }
 0x222   : > { %766 = vmatpush.msra.mxu2 %v673_v10  ;;  %789 = vmatpush.msra.mxu3 %v674_v11 }
 0x224   : > { %790 = vmatpush.msra.mxu3 %v663_v12  ;;  %v642_v16 = vpop.permute.xlu1 %641  ;;  %767 = vmatpush.msra.mxu2 %v662_v14 }
 0x225   : > { %v647_v17 = vsel %vm378_vm8, %v646_v15, %v642_v16  ;;  %v650_v18 = vsel %vm378_vm8, %v642_v16, %v646_v15 }
 0x226   : > { %v651_v19 = vmul.f32 %v650_v18, %v1637_v25  ;;  %v652_v21 = vmul.f32 %v647_v17, %v1640_v35 }
 0x228   : > { %768 = vmatpush.msra.mxu2 %v651_v19  ;;  %791 = vmatpush.msra.mxu3 %v652_v21 }
 0x229   : > { %1334 = vmatmul.msk.f32.vlgmr.msra.gmra.mxu2 %vm746_vm10, %v732_v30  ;;  %1336 = vmatmul.msk.f32.vlgmr.msra.gmra.mxu3 %vm746_vm10, %v732_v30 }
 0x22c   : > { %v739_v33 = vpop.permute.xlu1 %738 }
 0x231   : > { %1335 = vmatmul.msk.f32.gmra.mxu2 %vm746_vm10, %v733_v32  ;;  %1337 = vmatmul.msk.f32.gmra.mxu3 %vm746_vm10, %v733_v32 }
 0x2ac   : > { %v793_v37 = vpop.f32.mrf.mxu3  ;;  %v770_v39 = vpop.f32.mrf.mxu2 }
 0x2ad   : > { %v794_v40 = vadd.f32 %v793_v37, %v739_v33  ;;  %v771_v41 = vadd.f32 %v770_v39, %v739_v33 }
 0x2af   : > { %v1719_v42 = vmax.f32 %v794_v40, 0.0  ;;  %v1721_v43 = vmax.f32 %v771_v41, 0.0 }
 0x2b1   : > { %923 = vrot.lane.b32.xlu0 %v1719_v42, %s1389_s23  ;;  %945 = vrot.lane.b32.xlu2 %v1719_v42, %s1390_s24 }
 0x2b2   : > { %943 = vrot.lane.b32.xlu1 %v1721_v43, %s1390_s24 }
 0x2b4   : > { %v796_v44 = vpop.f32.mrf.mxu3  ;;  %v773_v48 = vpop.f32.mrf.mxu2 }
 0x2b5   : > { %v797_v47 = vadd.f32 %v796_v44, %v744_v45  ;;  %v774_v31 = vadd.f32 %v773_v48, %v744_v45  ;;  %v895_v48 = vmul.f32 %v1721_v43, %v1532_v29 }
 0x2b7   : > { %v1741_v46 = vmax.f32 %v797_v47, 0.0  ;;  %v1749_v50 = vmax.f32 %v774_v31, 0.0 }
 0x2b9   : > { %899 = vrot.lane.b32.xlu0 %v1721_v43, %s1388_s22  ;;  %921 = vrot.lane.b32.xlu2 %v1721_v43, %s1389_s23  ;;  %v897_v41 = vmul.f32 %v1749_v50, %v1532_v29 }
 0x2ba   : > { %901 = vrot.lane.b32.xlu1 %v1719_v42, %s1388_s22 }
 0x2c1   : > { %965 = vrot.lane.b32.xlu0 %v1721_v43, %s1391_s25  ;;  %879 = vrot.lane.b32.xlu2 %v1721_v43, %s1387_s21 }
 0x2c2   : > { %873 = vrot.lane.b32.xlu1 %v1719_v42, %s1387_s21 }
 0x2c9   : > { %949 = vrot.lane.b32.xlu0 %v1741_v46, %s1390_s24  ;;  %857 = vrot.lane.b32.xlu2 %v1721_v43, %s1386_s20 }
 0x2ca   : > { %851 = vrot.lane.b32.xlu1 %v1719_v42, %s1386_s20 }
 0x2d1   : > { %925 = vrot.lane.b32.xlu0 %v1749_v50, %s1389_s23  ;;  %947 = vrot.lane.b32.xlu2 %v1749_v50, %s1390_s24 }
 0x2d2   : > { %967 = vrot.lane.b32.xlu1 %v1719_v42, %s1391_s25 }
 0x2d9   : > { %881 = vrot.lane.b32.xlu0 %v1749_v50, %s1387_s21  ;;  %835 = vrot.lane.b32.xlu2 %v1721_v43, %s1385_s19 }
 0x2da   : > { %927 = vrot.lane.b32.xlu1 %v1741_v46, %s1389_s23 }
 0x2e1   : > { %853 = vrot.lane.b32.xlu0 %v1741_v46, %s1386_s20  ;;  %905 = vrot.lane.b32.xlu2 %v1741_v46, %s1388_s22 }
 0x2e2   : > { %903 = vrot.lane.b32.xlu1 %v1749_v50, %s1388_s22 }
 0x2e9   : > { %971 = vrot.lane.b32.xlu0 %v1741_v46, %s1391_s25  ;;  %875 = vrot.lane.b32.xlu2 %v1741_v46, %s1387_s21 }
 0x2ea   : > { %829 = vrot.lane.b32.xlu1 %v1719_v42, %s1385_s19 }
 0x2f1   : > { %837 = vrot.lane.b32.xlu0 %v1749_v50, %s1385_s19  ;;  %969 = vrot.lane.b32.xlu2 %v1749_v50, %s1391_s25 }
 0x2f2   : > { %859 = vrot.lane.b32.xlu1 %v1749_v50, %s1386_s20 }
 0x2f9   : > { %807 = vrot.lane.b32.xlu0 %v1741_v46, %s1392_s26  ;;  %831 = vrot.lane.b32.xlu2 %v1741_v46, %s1385_s19 }
 0x2fa   : > { %815 = vrot.lane.b32.xlu1 %v1749_v50, %s1392_s26 }
 0x301   : > { %813 = vrot.lane.b32.xlu0 %v1721_v43, %s1392_s26  ;;  %805 = vrot.lane.b32.xlu2 %v1719_v42, %s1392_s26 }
 0x302   : > { %992 = vperm.xlu1 %1366, %v989_v36  }
 0x30b   : > { %v946_v38 = vpop.permute.xlu2 %945 }
 0x313   : > { %v922_v51 = vpop.permute.xlu2 %921 }
 0x31b   : > { %v1794_v52 = vpop.permute.xlu2 %879 }
 0x323   : > { %v924_v53 = vpop.permute.xlu0 %923  ;;  %v1799_v59 = vpop.permute.xlu2 %857 }
 0x324   : > { %v1797_v54 = vsel %vm487_vm4, %v924_v53, %v922_v51  ;;  %v944_v56 = vpop.permute.xlu1 %943  ;;  %v929_v16 = vsel %vm487_vm4, %v922_v51, %v924_v53 }
 0x325   : > { %v951_v26 = vsel %vm508_vm5, %v944_v56, %v946_v38  ;;  %v939_v19 = vmul.f32 %v929_v16, %v1604_v22 }
 0x326   : > { %v961_v9 = vmul.f32 %v951_v26, %v1574_v1 }
 0x32b   : > { %v1801_v60 = vpop.permute.xlu0 %899  ;;  %v948_v63 = vpop.permute.xlu2 %947 }
 0x32c   : > { %v1803_v62 = vpop.permute.xlu1 %901 }
 0x32d   : > { %v907_v33 = vsel %vm466_vm2, %v1801_v60, %v1803_v62 }
 0x32e   : > { %v917_v40 = vmul.f32 %v907_v33, %v1586_v8 }
 0x333   : > { %v966_v0 = vpop.permute.xlu0 %965  ;;  %v1811_v6 = vpop.permute.xlu2 %835 }
 0x334   : > { %v1805_v2 = vpop.permute.xlu1 %873 }
 0x335   : > { %v889_v50 = vsel %vm441_vm3, %v1805_v2, %v1794_v52 }
 0x33b   : > { %v950_v28 = vpop.permute.xlu0 %949  ;;  %v906_v12 = vpop.permute.xlu2 %905 }
 0x33c   : > { %v952_v4 = vsel %vm508_vm5, %v948_v63, %v950_v28  ;;  %v1809_v5 = vpop.permute.xlu1 %851 }
 0x33d   : > { %v963_v7 = vmul.f32 %v952_v4, %v1574_v1  ;;  %v960_v4 = vsel %vm508_vm5, %v950_v28, %v948_v63  ;;  %v891_v63 = vmul.f32 %v889_v50, %v1591_v13  ;;  %v988_v28 = vld [vmem:[%s1994_s6 + $0x8] sm:$0xff] }
 0x33f   : > { %998 = vmatpush.msrb.mxu0 %v963_v7 }
 0x341   : > { %999 = vmatpush.msrb.mxu0 %v961_v9  ;;  %v959_v9 = vsel %vm508_vm5, %v946_v38, %v944_v56 }
 0x342   : > { %v962_v38 = vmul.f32 %v959_v9, %v1565_v58 }
 0x343   : > { %v926_v10 = vpop.permute.xlu0 %925  ;;  %v1821_v21 = vpop.permute.xlu2 %875 }
 0x344   : > { %v968_v11 = vpop.permute.xlu1 %967 }
 0x345   : > { %v973_v31 = vsel %vm529_vm1, %v966_v0, %v968_v11  ;;  %v981_v36 = vsel %vm529_vm1, %v968_v11, %v966_v0 }
 0x346   : > { %v983_v11 = vmul.f32 %v1600_v20, %v973_v31  ;;  %v984_v16 = vmul.f32 %v1552_v49, %v981_v36  ;;  %v898_v36 = vmul.f32 %v1741_v46, %v1524_v27 }
 0x34b   : > { %v1815_v14 = vpop.permute.xlu0 %881  ;;  %v970_v45 = vpop.permute.xlu2 %969 }
 0x34c   : > { %v928_v15 = vpop.permute.xlu1 %927  ;;  %v890_v44 = vsel %vm441_vm3, %v1821_v21, %v1815_v14 }
 0x34d   : > { %v930_v17 = vsel %vm487_vm4, %v926_v10, %v928_v15  ;;  %v893_v0 = vmul.f32 %v890_v44, %v1591_v13  ;;  %v915_v44 = vsel %vm466_vm2, %v1803_v62, %v1801_v60 }
 0x34e   : > { %v941_v18 = vmul.f32 %v930_v17, %v1604_v22  ;;  %v964_v17 = vmul.f32 %v960_v4, %v1565_v58  ;;  %v896_v4 = vmul.f32 %v1719_v42, %v1524_v27 }
 0x350   : > { %1000 = vmatpush.msrb.mxu0 %v941_v18  ;;  %v938_v18 = vsel %vm487_vm4, %v928_v15, %v926_v10 }
 0x352   : > { %1001 = vmatpush.msrb.mxu0 %v939_v19  ;;  %v942_v19 = vmul.f32 %v938_v18, %v1570_v61 }
 0x353   : > { %v1823_v30 = vpop.permute.xlu0 %853 }
 0x354   : > { %v904_v32 = vpop.permute.xlu1 %903 }
 0x355   : > { %v908_v37 = vsel %vm466_vm2, %v904_v32, %v906_v12  ;;  %v916_v10 = vsel %vm466_vm2, %v906_v12, %v904_v32  ;;  %v918_v32 = vmul.f32 %v915_v44, %v1557_v55  ;;  %v1173_v44 = vld [vmem:[%s1997_s9] sm:$0xf] }
 0x356   : > { %v919_v39 = vmul.f32 %v908_v37, %v1586_v8  ;;  %v867_v37 = vsel %vm420_vm6, %v1809_v5, %v1799_v59 }
 0x357   : > { %v869_v12 = vmul.f32 %v867_v37, %v1615_v34 }
 0x358   : > { %1002 = vmatpush.msrb.mxu0 %v919_v39  ;;  %v940_v39 = vmul.f32 %v1797_v54, %v1570_v61 }
 0x35a   : > { %1003 = vmatpush.msrb.mxu0 %v917_v40  ;;  %v832_v40 = vpop.permute.xlu2 %831 }
 0x35b   : > { %v972_v47 = vpop.permute.xlu0 %971 }
 0x35c   : > { %v974_v51 = vsel %vm529_vm1, %v970_v45, %v972_v47  ;;  %v982_v53 = vsel %vm529_vm1, %v972_v47, %v970_v45  ;;  %1004 = vmatpush.msrb.mxu0 %v897_v41  ;;  %v1842_v26 = vpop.permute.xlu1 %829  ;;  %v920_v47 = vmul.f32 %v916_v10, %v1557_v55 }
 0x35d   : > { %v985_v7 = vmul.f32 %v1600_v20, %v974_v51  ;;  %v986_v43 = vmul.f32 %v1552_v49, %v982_v53  ;;  %v845_v54 = vsel %vm399_vm7, %v1842_v26, %v1811_v6  ;;  %v884_v51 = vsel %vm441_vm3, %v1815_v14, %v1821_v21 }
 0x35e   : > { %1005 = vmatpush.msrb.mxu0 %v895_v48  ;;  %v847_v62 = vmul.f32 %v845_v54, %v1607_v23  ;;  %v861_v21 = vsel %vm420_vm6, %v1799_v59, %v1809_v5  ;;  %v839_v59 = vsel %vm399_vm7, %v1811_v6, %v1842_v26 }
 0x35f   : > { %1032 = vmatpush.msrb.mxu1 %v985_v7  ;;  %1072 = vmatpush.msrb.mxu2 %v986_v43  ;;  %v883_v7 = vsel %vm441_vm3, %v1794_v52, %v1805_v2  ;;  %v894_v43 = vmul.f32 %v884_v51, %v1562_v57 }
 0x360   : > { %1006 = vmatpush.msrb.mxu0 %v893_v0  ;;  %v892_v14 = vmul.f32 %v883_v7, %v1562_v57 }
 0x361   : > { %1033 = vmatpush.msrb.mxu1 %v983_v11  ;;  %1073 = vmatpush.msrb.mxu2 %v984_v16  ;;  %v870_v16 = vmul.f32 %v861_v21, %v1578_v3 }
 0x362   : > { %1007 = vmatpush.msrb.mxu0 %v891_v63  ;;  %1338 = vmatmul.msk.f32.vlgmr.msrb.gmra.mxu1 %vm399_vm7, %v988_v28  ;;  %v806_v0 = vpop.permute.xlu2 %805  ;;  %v848_v63 = vmul.f32 %v839_v59, %v1610_v24 }
 0x363   : > { %1038 = vmatpush.msra.mxu1 %v964_v17  ;;  %v838_v56 = vpop.permute.xlu0 %837  ;;  %1339 = vmatmul.msk.f32.vlgmr.msrb.gmra.mxu2 %vm399_vm7, %v988_v28 }
 0x364   : > { %v860_v33 = vpop.permute.xlu1 %859  ;;  %v846_v45 = vsel %vm399_vm7, %v832_v40, %v838_v56  ;;  %v840_v2 = vsel %vm399_vm7, %v838_v56, %v832_v40 }
 0x365   : > { %1039 = vmatpush.msra.mxu1 %v962_v38  ;;  %v868_v15 = vsel %vm420_vm6, %v1823_v30, %v860_v33  ;;  %v849_v48 = vmul.f32 %v846_v45, %v1607_v23  ;;  %v862_v46 = vsel %vm420_vm6, %v860_v33, %v1823_v30  ;;  %v987_v30 = vld [vmem:[%s1994_s6] sm:$0xff]  ;;  %v850_v5 = vmul.f32 %v840_v2, %v1610_v24 }
 0x366   : > { %v871_v41 = vmul.f32 %v868_v15, %v1615_v34  ;;  %v872_v9 = vmul.f32 %v862_v46, %v1578_v3 }
 0x367   : > { %1040 = vmatpush.msra.mxu1 %v942_v19 }
 0x368   : > { %1008 = vmatpush.msrb.mxu0 %v871_v41 }
 0x369   : > { %1041 = vmatpush.msra.mxu1 %v940_v39 }
 0x36a   : > { %1009 = vmatpush.msrb.mxu0 %v869_v12 }
 0x36b   : > { %1042 = vmatpush.msra.mxu1 %v920_v47  ;;  %v808_v31 = vpop.permute.xlu0 %807 }
 0x36c   : > { %v816_v60 = vpop.permute.xlu1 %815  ;;  %1010 = vmatpush.msrb.mxu0 %v849_v48 }
 0x36d   : > { %1043 = vmatpush.msra.mxu1 %v918_v32  ;;  %v824_v53 = vsel %vm378_vm8, %v808_v31, %v816_v60  ;;  %v818_v17 = vsel %vm378_vm8, %v816_v60, %v808_v31 }
 0x36e   : > { %1011 = vmatpush.msrb.mxu0 %v847_v62  ;;  %v827_v50 = vmul.f32 %v824_v53, %v1637_v25  ;;  %v828_v18 = vmul.f32 %v818_v17, %v1640_v35 }
 0x36f   : > { %1044 = vmatpush.msra.mxu1 %v898_v36 }
 0x370   : > { %1012 = vmatpush.msrb.mxu0 %v827_v50 }
 0x371   : > { %1045 = vmatpush.msra.mxu1 %v896_v4 }
 0x373   : > { %1046 = vmatpush.msra.mxu1 %v894_v43  ;;  %v814_v42 = vpop.permute.xlu0 %813 }
 0x374   : > { %v823_v52 = vsel %vm378_vm8, %v806_v0, %v814_v42  ;;  %v817_v28 = vsel %vm378_vm8, %v814_v42, %v806_v0  ;;  %v993_v26 = vpop.permute.xlu1 %992 }
 0x375   : > { %1047 = vmatpush.msra.mxu1 %v892_v14  ;;  %v825_v11 = vmul.f32 %v823_v52, %v1637_v25  ;;  %v826_v38 = vmul.f32 %v817_v28, %v1640_v35 }
 0x377   : > { %1048 = vmatpush.msra.mxu1 %v872_v9  ;;  %1013 = vmatpush.msrb.mxu0 %v825_v11 }
 0x378   : > { %1014 = vmatmul.f32.vlgmr.msrb.gmra.mxu0 %v987_v30 }
 0x379   : > { %1049 = vmatpush.msra.mxu1 %v870_v16 }
 0x37b   : > { %1050 = vmatpush.msra.mxu1 %v850_v5 }
 0x37d   : > { %1051 = vmatpush.msra.mxu1 %v848_v63 }
 0x37f   : > { %1052 = vmatpush.msra.mxu1 %v828_v18 }
 0x381   : > { %1053 = vmatpush.msra.mxu1 %v826_v38 }
 0x382   : > { %1054 = vmatmul.f32.vlgmr.msra.gmra.mxu1 %v987_v30 }
 0x3df   : > { %v1035_v6 = vpop.f32.mrf.mxu1 }
 0x3e6   : > { %v1075_v15 = vpop.f32.mrf.mxu2 }
 0x3f5   : > { %v1015_v56 = vpop.f32.mrf.mxu0 }
 0x3f6   : > { %v1016_v19 = vadd.f32 %v1015_v56, %v993_v26  ;;  %v1172_v56 = vld [vmem:[%s1996_s8] sm:$0xf] }
 0x3f8   : > { %v1036_v33 = vadd.f32 %v1035_v6, %v1016_v19 }
 0x3fa   : > { %v1078_v37 = vmax.f32 %v1036_v33, 0.0 }
 0x3fc   : > { %1150 = vrot.lane.b32.xlu1 %v1078_v37, %s1390_s24  ;;  %1161 = vrot.lane.b32.xlu2 %v1078_v37, %s1391_s25 }
 0x3ff   : > { %v1055_v10 = vpop.f32.mrf.mxu1 }
 0x400   : > { %v1056_v39 = vadd.f32 %v1055_v10, %v993_v26 }
 0x402   : > { %v1076_v40 = vadd.f32 %v1075_v15, %v1056_v39 }
 0x404   : > { %v1079_v41 = vmax.f32 %v1076_v40, 0.0 }
 0x406   : > { %1163 = vrot.lane.b32.xlu0 %v1079_v41, %s1391_s25  ;;  %1141 = vrot.lane.b32.xlu1 %v1079_v41, %s1389_s23  ;;  %v1127_v11 = vmul.f32 %v1079_v41, %v1524_v27  ;;  %s359_s25 = scalar_lea.vmem %s1998_s10, %s1346_s15 }
 0x407   : > { %1152 = vrot.lane.b32.xlu2 %v1079_v41, %s1390_s24 }
 0x40e   : > { %1139 = vrot.lane.b32.xlu0 %v1078_v37, %s1389_s23  ;;  %1115 = vrot.lane.b32.xlu1 %v1079_v41, %s1387_s21 }
 0x40f   : > { %1128 = vrot.lane.b32.xlu2 %v1078_v37, %s1388_s22 }
 0x416   : > { %1130 = vrot.lane.b32.xlu0 %v1079_v41, %s1388_s22  ;;  %1107 = vrot.lane.b32.xlu1 %v1078_v37, %s1386_s20 }
 0x417   : > { %1118 = vrot.lane.b32.xlu2 %v1078_v37, %s1387_s21 }
 0x41e   : > { %1104 = vrot.lane.b32.xlu0 %v1079_v41, %s1386_s20  ;;  %1081 = vrot.lane.b32.xlu1 %v1079_v41, %s1392_s26 }
 0x41f   : > { %1093 = vrot.lane.b32.xlu2 %v1079_v41, %s1385_s19 }
 0x426   : > { %1096 = vrot.lane.b32.xlu0 %v1078_v37, %s1385_s19 }
 0x427   : > { %1085 = vrot.lane.b32.xlu2 %v1078_v37, %s1392_s26 }
 0x42e   : > { %1176 = vperm.xlu0 %1365, %v1173_v44  }
 0x456   : > { %v1162_v45 = vpop.permute.xlu2 %1161 }
 0x461   : > { %v1153_v12 = vpop.permute.xlu2 %1152 }
 0x469   : > { %v1129_v36 = vpop.permute.xlu2 %1128 }
 0x46e   : > { %v1151_v47 = vpop.permute.xlu1 %1150 }
 0x46f   : > { %v1154_v48 = vsel %vm508_vm5, %v1151_v47, %v1153_v12  ;;  %v1158_v31 = vsel %vm508_vm5, %v1153_v12, %v1151_v47 }
 0x470   : > { %v1160_v50 = vmul.f32 %v1158_v31, %v1565_v58  ;;  %v1159_v4 = vmul.f32 %v1154_v48, %v1574_v1 }
 0x471   : > { %v1119_v0 = vpop.permute.xlu2 %1118 }
 0x478   : > { %v1164_v54 = vpop.permute.xlu0 %1163  ;;  %v1142_v32 = vpop.permute.xlu1 %1141 }
 0x479   : > { %v1165_v60 = vsel %vm529_vm1, %v1162_v45, %v1164_v54  ;;  %v1169_v62 = vsel %vm529_vm1, %v1164_v54, %v1162_v45  ;;  %v1094_v30 = vpop.permute.xlu2 %1093 }
 0x47a   : > { %v1171_v51 = vmul.f32 %v1552_v49, %v1169_v62  ;;  %v1170_v53 = vmul.f32 %v1600_v20, %v1165_v60 }
 0x47c   : > { %1189 = vmatpush.msrb.mxu3 %v1170_v53  ;;  %1209 = vmatpush.msra.mxu2 %v1171_v51 }
 0x47e   : > { %1190 = vmatpush.msrb.mxu3 %v1159_v4  ;;  %1210 = vmatpush.msra.mxu2 %v1160_v50 }
 0x480   : > { %v1140_v7 = vpop.permute.xlu0 %1139  ;;  %v1116_v21 = vpop.permute.xlu1 %1115 }
 0x481   : > { %v1143_v43 = vsel %vm487_vm4, %v1140_v7, %v1142_v32  ;;  %v1147_v46 = vsel %vm487_vm4, %v1142_v32, %v1140_v7  ;;  %v1120_v52 = vsel %vm441_vm3, %v1119_v0, %v1116_v21  ;;  %v1123_v2 = vsel %vm441_vm3, %v1116_v21, %v1119_v0  ;;  %v1086_v63 = vpop.permute.xlu2 %1085 }
 0x482   : > { %v1149_v14 = vmul.f32 %v1147_v46, %v1570_v61  ;;  %v1148_v49 = vmul.f32 %v1143_v43, %v1604_v22  ;;  %v1126_v22 = vmul.f32 %v1078_v37, %v1532_v29  ;;  %v1125_v16 = vmul.f32 %v1120_v52, %v1562_v57 }
 0x484   : > { %1191 = vmatpush.msrb.mxu3 %v1148_v49  ;;  %1211 = vmatpush.msra.mxu2 %v1149_v14 }
 0x488   : > { %v1131_v58 = vpop.permute.xlu0 %1130  ;;  %v1108_v61 = vpop.permute.xlu1 %1107 }
 0x489   : > { %v1132_v20 = vsel %vm466_vm2, %v1129_v36, %v1131_v58  ;;  %v1136_v1 = vsel %vm466_vm2, %v1131_v58, %v1129_v36 }
 0x48a   : > { %v1138_v42 = vmul.f32 %v1136_v1, %v1557_v55  ;;  %v1137_v9 = vmul.f32 %v1132_v20, %v1586_v8  ;;  %v1124_v55 = vmul.f32 %v1123_v2, %v1591_v13 }
 0x48c   : > { %1192 = vmatpush.msrb.mxu3 %v1137_v9  ;;  %1212 = vmatpush.msra.mxu2 %v1138_v42 }
 0x48e   : > { %1193 = vmatpush.msrb.mxu3 %v1126_v22  ;;  %1213 = vmatpush.msra.mxu2 %v1127_v11 }
 0x490   : > { %v1105_v59 = vpop.permute.xlu0 %1104  ;;  %1194 = vmatpush.msrb.mxu3 %v1124_v55  ;;  %1214 = vmatpush.msra.mxu2 %v1125_v16  ;;  %v1082_v27 = vpop.permute.xlu1 %1081 }
 0x491   : > { %v1109_v8 = vsel %vm420_vm6, %v1108_v61, %v1105_v59  ;;  %v1112_v5 = vsel %vm420_vm6, %v1105_v59, %v1108_v61  ;;  %v1087_v28 = vsel %vm378_vm8, %v1086_v63, %v1082_v27  ;;  %v1090_v13 = vsel %vm378_vm8, %v1082_v27, %v1086_v63 }
 0x492   : > { %v1114_v17 = vmul.f32 %v1109_v8, %v1578_v3  ;;  %v1113_v29 = vmul.f32 %v1112_v5, %v1615_v34  ;;  %v1092_v3 = vmul.f32 %v1087_v28, %v1640_v35  ;;  %v1091_v34 = vmul.f32 %v1090_v13, %v1637_v25 }
 0x494   : > { %1195 = vmatpush.msrb.mxu3 %v1113_v29  ;;  %1215 = vmatpush.msra.mxu2 %v1114_v17 }
 0x498   : > { %v1097_v57 = vpop.permute.xlu0 %1096 }
 0x499   : > { %v1098_v18 = vsel %vm399_vm7, %v1097_v57, %v1094_v30  ;;  %v1101_v38 = vsel %vm399_vm7, %v1094_v30, %v1097_v57 }
 0x49a   : > { %v1103_v6 = vmul.f32 %v1098_v18, %v1610_v24  ;;  %v1102_v26 = vmul.f32 %v1101_v38, %v1607_v23 }
 0x49c   : > { %1196 = vmatpush.msrb.mxu3 %v1102_v26  ;;  %1216 = vmatpush.msra.mxu2 %v1103_v6 }
 0x49e   : > { %1197 = vmatpush.msrb.mxu3 %v1091_v34  ;;  %1217 = vmatpush.msra.mxu2 %v1092_v3 }
 0x49f   : > { %1340 = vmatmul.msk.f32.vlgmr.msrb.gmra.mxu3 %vm746_vm10, %v1172_v56  ;;  %1341 = vmatmul.msk.f32.vlgmr.msra.gmra.mxu2 %vm746_vm10, %v1172_v56 }
 0x4a0   : > { %v1177_v19 = vpop.permute.xlu0 %1176 }
 0x522   : > { %v1199_v24 = vpop.f32.mrf.mxu3  ;;  %v1219_v33 = vpop.f32.mrf.mxu2 }
 0x523   : > { %v1200_v23 = vadd.f32 %v1199_v24, %v1177_v19  ;;  %v1220_v37 = vadd.f32 %v1219_v33, %v1177_v19 }
 0x525   : > { %v1342_v35 = vmul.f32 -1.442695, %v1200_v23  ;;  %v1343_v10 = vmul.f32 -1.442695, %v1220_v37 }
 0x527   : > { %1369 = vpow2.f32 %v1342_v35 }
 0x528   : > { %1371 = vpow2.f32 %v1343_v10 }
 0x52d   : > { %v1370_v25 = vpop.eup %1369 }
 0x52e   : > { %v1372_v15 = vpop.eup %1371  ;;  %v1228_v39 = vadd.f32 1.0, %v1370_v25 }
 0x52f   : > { %v1229_v40 = vadd.f32 1.0, %v1372_v15 }
 0x530   : > { %1373 = vrcp.f32 %v1228_v39  ;;  %vm1235_vm13 = vweird.f32 %v1228_v39  ;;  %v1241_v36 = vand.u32 2147483648, %v1228_v39  ;;  %v1239_v51 = vand.u32 2147483647, %v1228_v39 }
 0x531   : > { %1375 = vrcp.f32 %v1229_v40  ;;  %v1256_v48 = vand.u32 2147483648, %v1229_v40  ;;  %v1254_v60 = vand.u32 2147483647, %v1229_v40  ;;  %vm1250_vm15 = vweird.f32 %v1229_v40 }
 0x532   : > { %v1242_v43 = vor.u32 1.1754944e-38, %v1241_v36  ;;  %vm1240_vm3 = vcmp.eq.f32.partialorder %v1239_v51, 8.507059e+37 }
 0x533   : > { %v1257_v50 = vor.u32 1.1754944e-38, %v1256_v48  ;;  %vm1255_vm2 = vcmp.eq.f32.partialorder %v1254_v60, 8.507059e+37 }
 0x536   : > { %v1374_v41 = vpop.eup %1373 }
 0x537   : > { %v1376_v44 = vpop.eup %1375  ;;  %v1231_v45 = vmul.f32 %v1374_v41, %v1228_v39  ;;  %vm1236_vm11 = vweird.f32 %v1374_v41 }
 0x538   : > { %v1246_v47 = vmul.f32 %v1376_v44, %v1229_v40  ;;  %vm1251_vm12 = vweird.f32 %v1376_v44  ;;  %vm1237_vm14 = vmor %vm1235_vm13, %vm1236_vm11 }
 0x539   : > { %v1232_v12 = vsub.f32 1.0, %v1231_v45  ;;  %vm1252_vm1 = vmor %vm1250_vm15, %vm1251_vm12 }
 0x53a   : > { %v1247_v54 = vsub.f32 1.0, %v1246_v47 }
 0x53b   : > { %v1233_v32 = vmul.f32 %v1374_v41, %v1232_v12 }
 0x53c   : > { %v1248_v31 = vmul.f32 %v1376_v44, %v1247_v54 }
 0x53d   : > { %v1234_v62 = vadd.f32 %v1374_v41, %v1233_v32 }
 0x53e   : > { %v1249_v53 = vadd.f32 %v1376_v44, %v1248_v31 }
 0x53f   : > { %v1238_v4 = vsel %vm1237_vm14, %v1374_v41, %v1234_v62 }
 0x540   : > { %v1253_v7 = vsel %vm1252_vm1, %v1376_v44, %v1249_v53  ;;  %v1243_v21 = vsel %vm1240_vm3, %v1242_v43, %v1238_v4 }
 0x541   : > { %v1258_v46 = vsel %vm1255_vm2, %v1257_v50, %v1253_v7 }
 0x542   : > { %v1262_v14 = vrot.slane %v1258_v46, 4 }
 0x544   : > { %v1263_v49 = vsel %vm455_vm0, %v1243_v21, %v1262_v14 }
 0x545   : > { %1265 = vst [vmem:[%s359_s25] sm:$0xff] %v1263_v49 }
 0x546 PF: > { %s20_s13 = sadd.s32 1, %s1383_s13  }
 0x547   : > { %p17_p4 = scmp.ge.s32.totalorder %s20_s13, 4  }
 0x549   :  { %19 = sbr.rel (!%p17_p4) target bundleno = 1 (0x1), region = 90 }

</bundles_post_ra>
